<compile_context>
chip_gen: v7x
topology: tpu7x:2x2x1
jax: 0.10.0
libtpu: 0.0.40
codegen_flags: <defaults>
</compile_context>

<pallas_src>
import jax
import jax.numpy as jnp
from jax import lax
from jax.experimental import pallas as pl
from jax.experimental.pallas import tpu as pltpu


def _mamba_ssm_kernel(x_ref, wx_e_ref, whxd_ref, b_e_ref, b_d_ref,
                      whdfc_ref, bfc_ref,
                      out_ref,
                      proj_ref):
    """One batch tile: encoder + decoder recurrences with folded projections.

    x_ref     : (T, TB, I)     bf16  inputs (time-major)
    wx_e_ref  : (I, 4H)        bf16  encoder input->gates (cols i|f|g|o)
    whxd_ref  : (H, 8H)        bf16  [enc W_hh | dec W_ih] fused per-step RHS
    b_e_ref   : (1, 4H)        f32   encoder b_ih + b_hh
    b_d_ref   : (1, 4H)        f32   decoder b_ih + b_hh
    whdfc_ref : (H, 4H + O)    bf16  [dec W_hh | fc W] fused per-step RHS
    bfc_ref   : (1, O)         f32
    out_ref   : (T, TB, O)     f32
    proj_ref  : (T*TB, 4H)     f32   scratch: encoder, then decoder, gate proj
    """
    T, TB, I = x_ref.shape
    H = whxd_ref.shape[0]
    G = 4 * H
    M = T * TB
    unroll = max(1, min(T, 8))

    whxd = whxd_ref[...]
    whdfc = whdfc_ref[...]
    b_d = b_d_ref[...]
    bfc = bfc_ref[...]

    # ---- phase 1: encoder input projection for ALL T steps (one MXU matmul) --
    x2d = x_ref[...].reshape(M, I)
    proj_ref[...] = (jnp.dot(x2d, wx_e_ref[...],
                             preferred_element_type=jnp.float32) + b_e_ref[...])

    def make_step(w_comb, extra_b, write_extra):
        # One (TB,H)@(H,4H+X) MXU push per step: cols [0,4H) are the recurrent
        # gate contribution h_{t-1} @ W_hh, cols [4H,·) are the projection of
        # h_{t-1} (= previous step's hidden output) through the *next* stage's
        # weights, written back for row t-1 (free MXU filler).
        def step(t, carry):
            h, c = carry
            hw = jnp.dot(h.astype(jnp.bfloat16), w_comb,
                         preferred_element_type=jnp.float32)

            row = pl.multiple_of(t * TB, TB)
            gates = proj_ref[pl.ds(row, TB), :] + hw[:, :G]

            @pl.when(t > 0)
            def _():
                write_extra(t - 1, hw[:, G:] + extra_b)

            # one full-width sigmoid over the whole (TB, 4H) slab
            sig = jax.nn.sigmoid(gates)
            i = sig[:, 0:H]
            f = sig[:, H:2 * H]
            o = sig[:, 3 * H:4 * H]
            g = jnp.tanh(gates[:, 2 * H:3 * H])
            c = f * c + i * g
            h = o * jnp.tanh(c)
            return h, c
        return step

    def write_dec_proj(t, val):                 # decoder input proj for row t
        row = pl.multiple_of(t * TB, TB)
        proj_ref[pl.ds(row, TB), :] = val

    def write_out(t, val):                      # fc head output for row t
        out_ref[t, :, :] = val

    # ---- phase 2: encoder recurrence (h0 = c0 = 0).  Also overwrites the
    # already-consumed encoder proj rows 0..T-2 with decoder input projs. ----
    h0 = jnp.zeros((TB, H), jnp.float32)
    c0 = jnp.zeros((TB, H), jnp.float32)
    hn, cn = lax.fori_loop(0, T, make_step(whxd, b_d, write_dec_proj),
                           (h0, c0), unroll=unroll)
    # last decoder-input projection row (uses the final encoder hidden state)
    proj_ref[pl.ds((T - 1) * TB, TB), :] = (
        jnp.dot(hn.astype(jnp.bfloat16), whxd[:, G:],
                preferred_element_type=jnp.float32) + b_d)

    # ---- phase 3: decoder recurrence seeded with (hn, cn); fc head folded in,
    # writing output rows 0..T-2 on the fly. ----
    hd, _ = lax.fori_loop(0, T, make_step(whdfc, bfc, write_out),
                          (hn, cn), unroll=unroll)
    out_ref[T - 1, :, :] = (
        jnp.dot(hd.astype(jnp.bfloat16), whdfc[:, G:],
                preferred_element_type=jnp.float32) + bfc)


def _fuse_lstm_weights(w_ih, w_hh, b_ih, b_hh):
    """PyTorch LSTM params -> fused (in,4H)/(H,4H) bf16 weights + (1,4H) f32 bias."""
    wx = jnp.asarray(w_ih).T.astype(jnp.bfloat16)   # (in, 4H), cols i|f|g|o
    wh = jnp.asarray(w_hh).T.astype(jnp.bfloat16)   # (H, 4H)
    b = (jnp.asarray(b_ih) + jnp.asarray(b_hh))[None, :].astype(jnp.float32)
    return wx, wh, b


def _vmem_limit_bytes():
    # Generation-aware scoped-VMEM limit: ~3/4 of physical, capped at 100 MiB.
    # 128 MiB physical (v5e/v6e) -> 96 MiB; 64 MiB (v7x) -> 48 MiB.
    cap = 128 * 1024 * 1024
    try:
        cap = int(getattr(pltpu.get_tpu_info(), "vmem_capacity_bytes", cap))
    except Exception:
        pass
    return int(min(cap * 3 // 4, 100 * 1024 * 1024))


def mamba_ssm_forward(x, p, *, batch_tile=None):
    """x: (B, T, input_size) float32, batch_first like the PyTorch module."""
    B, T, I = x.shape
    H = p['enc_w_hh'].shape[1]
    O = p['fc_w'].shape[0]
    assert H == O, "PyTorch MambaSSM only runs when hidden_size == output_size"

    # batch_tile is the primary tuning knob: the recurrence is latency-bound,
    # so larger tiles (64-256, ~128) ride the same per-step critical path for
    # free.  Default adapts so tiny batches are not padded all the way to 128.
    if batch_tile is None:
        batch_tile = min(128, pl.cdiv(B, 8) * 8)
    assert batch_tile % 8 == 0

    wx_e, wh_e, b_e = _fuse_lstm_weights(p['enc_w_ih'], p['enc_w_hh'],
                                         p['enc_b_ih'], p['enc_b_hh'])
    wx_d, wh_d, b_d = _fuse_lstm_weights(p['dec_w_ih'], p['dec_w_hh'],
                                         p['dec_b_ih'], p['dec_b_hh'])
    wfc = jnp.asarray(p['fc_w']).T.astype(jnp.bfloat16)        # (H, O)
    bfc = jnp.asarray(p['fc_b'])[None, :].astype(jnp.float32)  # (1, O)

    # Concatenated per-step RHS: one wide MXU push per recurrent step computes
    # both the gates (h @ W_hh) and the next stage's projection of h.
    whxd = jnp.concatenate([wh_e, wx_d], axis=1)    # (H, 8H)  enc gates | dec in-proj
    whdfc = jnp.concatenate([wh_d, wfc], axis=1)    # (H, 4H+O) dec gates | fc head

    # Pad batch to a multiple of the tile and go time-major (bf16 MXU operand).
    Bp = pl.cdiv(B, batch_tile) * batch_tile
    x_tm = jnp.transpose(x, (1, 0, 2)).astype(jnp.bfloat16)    # (T, B, I)
    if Bp != B:
        x_tm = jnp.pad(x_tm, ((0, 0), (0, Bp - B), (0, 0)))
    n_tiles = Bp // batch_tile

    def full(a):
        return pl.BlockSpec(a.shape, lambda b, nd=a.ndim: (0,) * nd)

    out_tm = pl.pallas_call(
        _mamba_ssm_kernel,
        out_shape=jax.ShapeDtypeStruct((T, Bp, O), jnp.float32),
        grid_spec=pltpu.PrefetchScalarGridSpec(
            num_scalar_prefetch=0,
            grid=(n_tiles,),
            in_specs=[
                pl.BlockSpec((T, batch_tile, I), lambda b: (0, b, 0)),
                full(wx_e), full(whxd), full(b_e), full(b_d),
                full(whdfc), full(bfc),
            ],
            out_specs=pl.BlockSpec((T, batch_tile, O), lambda b: (0, b, 0)),
            scratch_shapes=[
                pltpu.VMEM((T * batch_tile, 4 * H), jnp.float32),  # gate projections
            ]),
        compiler_params=pltpu.CompilerParams(
            dimension_semantics=("parallel",),
            vmem_limit_bytes=_vmem_limit_bytes()),
    )(x_tm, wx_e, whxd, b_e, b_d, whdfc, bfc)

    return jnp.transpose(out_tm[:, :B, :], (1, 0, 2))           # back to (B, T, O)


# ----------------------------- parameter init -----------------------------
def init_params(key, input_size, hidden_size, output_size):
    assert hidden_size == output_size, (
        "The PyTorch MambaSSM module only runs when hidden_size == output_size")
    ks = jax.random.split(key, 10)

    def u(k, shape, bound):
        return jax.random.uniform(k, shape, jnp.float32, -bound, bound)

    bh = 1.0 / (hidden_size ** 0.5)
    bo = 1.0 / (output_size ** 0.5)
    return dict(
        enc_w_ih=u(ks[0], (4 * hidden_size, input_size), bh),
        enc_w_hh=u(ks[1], (4 * hidden_size, hidden_size), bh),
        enc_b_ih=u(ks[2], (4 * hidden_size,), bh),
        enc_b_hh=u(ks[3], (4 * hidden_size,), bh),
        dec_w_ih=u(ks[4], (4 * output_size, hidden_size), bo),
        dec_w_hh=u(ks[5], (4 * output_size, output_size), bo),
        dec_b_ih=u(ks[6], (4 * output_size,), bo),
        dec_b_hh=u(ks[7], (4 * output_size,), bo),
        fc_w=u(ks[8], (output_size, hidden_size), bh),
        fc_b=u(ks[9], (output_size,), bh),
    )


# ------------------------ pure-JAX reference check ------------------------
def _lstm_ref(x, w_ih, w_hh, b_ih, b_hh, h0, c0):
    T = x.shape[1]
    h, c = h0, c0
    outs = []
    for t in range(T):
        gates = x[:, t] @ w_ih.T + h @ w_hh.T + b_ih + b_hh
        i, f, g, o = jnp.split(gates, 4, axis=-1)
        c = jax.nn.sigmoid(f) * c + jax.nn.sigmoid(i) * jnp.tanh(g)
        h = jax.nn.sigmoid(o) * jnp.tanh(c)
        outs.append(h)
    return jnp.stack(outs, axis=1), h, c


def mamba_ssm_ref(x, p):
    B = x.shape[0]
    H = p['enc_w_hh'].shape[1]
    z = jnp.zeros((B, H), jnp.float32)
    enc_out, hn, cn = _lstm_ref(x, p['enc_w_ih'], p['enc_w_hh'],
                                p['enc_b_ih'], p['enc_b_hh'], z, z)
    dec_out, _, _ = _lstm_ref(enc_out, p['dec_w_ih'], p['dec_w_hh'],
                              p['dec_b_ih'], p['dec_b_hh'], hn, cn)
    return dec_out @ p['fc_w'].T + p['fc_b']


if __name__ == "__main__":
    B, T = 2, 8
    input_size, hidden_size, output_size = 16, 32, 32

    key = jax.random.PRNGKey(0)
    kx, kp = jax.random.split(key)
    x = jax.random.normal(kx, (B, T, input_size), jnp.float32)
    params = init_params(kp, input_size, hidden_size, output_size)

    out = jax.block_until_ready(mamba_ssm_forward(x, params))
    ref = mamba_ssm_ref(x, params)

    assert out.shape == (B, T, output_size), out.shape
    max_err = float(jnp.max(jnp.abs(out - ref)))
    # bf16 MXU operands (f32 accumulation / f32 state) -> allow a slightly
    # looser tolerance than pure-f32; observed error is ~1e-3 scale.
    assert jnp.allclose(out, ref, atol=1e-2, rtol=1e-2), f"max abs err {max_err}"

    print("KERNEL_OK")
</pallas_src>

<mosaic_0001>
module attributes {stable_mosaic.version = 11 : i64} {
  func.func @_mamba_ssm_kernel(%arg0: i32, %arg1: memref<8x8x16xbf16, #tpu.memory_space<vmem>>, %arg2: memref<16x128xbf16, #tpu.memory_space<vmem>>, %arg3: memref<32x256xbf16, #tpu.memory_space<vmem>>, %arg4: memref<1x128xf32, #tpu.memory_space<vmem>>, %arg5: memref<1x128xf32, #tpu.memory_space<vmem>>, %arg6: memref<32x160xbf16, #tpu.memory_space<vmem>>, %arg7: memref<1x32xf32, #tpu.memory_space<vmem>>, %arg8: memref<8x8x32xf32, #tpu.memory_space<vmem>>, %arg9: memref<64x128xf32, #tpu.memory_space<vmem>>) attributes {dimension_semantics = [#tpu.dimension_semantics<parallel>], iteration_bounds = array<i64: 1>, scalar_prefetch = 0 : i64, scratch_operands = 1 : i64, tpu.core_type = #tpu.core_type<tc>, window_params = [{transform_indices = @transform_0, window_bounds = array<i64: 8, 8, 16>}, {pipeline_mode = #tpu.pipeline_mode<synchronous>, transform_indices = @transform_1, window_bounds = array<i64: 16, 128>}, {pipeline_mode = #tpu.pipeline_mode<synchronous>, transform_indices = @transform_2, window_bounds = array<i64: 32, 256>}, {pipeline_mode = #tpu.pipeline_mode<synchronous>, transform_indices = @transform_3, window_bounds = array<i64: 1, 128>}, {pipeline_mode = #tpu.pipeline_mode<synchronous>, transform_indices = @transform_4, window_bounds = array<i64: 1, 128>}, {pipeline_mode = #tpu.pipeline_mode<synchronous>, transform_indices = @transform_5, window_bounds = array<i64: 32, 160>}, {pipeline_mode = #tpu.pipeline_mode<synchronous>, transform_indices = @transform_6, window_bounds = array<i64: 1, 32>}, {transform_indices = @transform_7, window_bounds = array<i64: 8, 8, 32>}]} {
    %c0 = arith.constant 0 : index
    %c0_0 = arith.constant 0 : index
    %0 = vector.load %arg3[%c0, %c0_0] : memref<32x256xbf16, #tpu.memory_space<vmem>>, vector<32x256xbf16>
    %c0_1 = arith.constant 0 : index
    %c0_2 = arith.constant 0 : index
    %1 = vector.load %arg6[%c0_1, %c0_2] : memref<32x160xbf16, #tpu.memory_space<vmem>>, vector<32x160xbf16>
    %c0_3 = arith.constant 0 : index
    %c0_4 = arith.constant 0 : index
    %2 = vector.load %arg5[%c0_3, %c0_4] : memref<1x128xf32, #tpu.memory_space<vmem>>, vector<1x128xf32>
    %c0_5 = arith.constant 0 : index
    %c0_6 = arith.constant 0 : index
    %3 = vector.load %arg7[%c0_5, %c0_6] : memref<1x32xf32, #tpu.memory_space<vmem>>, vector<1x32xf32>
    %c0_7 = arith.constant 0 : index
    %c0_8 = arith.constant 0 : index
    %c0_9 = arith.constant 0 : index
    %4 = vector.load %arg1[%c0_7, %c0_8, %c0_9] : memref<8x8x16xbf16, #tpu.memory_space<vmem>>, vector<8x8x16xbf16>
    %5 = vector.shape_cast %4 : vector<8x8x16xbf16> to vector<64x16xbf16>
    %c0_10 = arith.constant 0 : index
    %c0_11 = arith.constant 0 : index
    %6 = vector.load %arg2[%c0_10, %c0_11] : memref<16x128xbf16, #tpu.memory_space<vmem>>, vector<16x128xbf16>
    %cst = arith.constant dense<0.000000e+00> : vector<64x128xf32>
    %7 = tpu.matmul %5, %6, %cst {dimension_numbers = #tpu.dot_dimension_numbers<[1], [0], [0], [1], [0, 0, 1, 1], [], []>} : vector<64x16xbf16>, vector<16x128xbf16>, vector<64x128xf32> -> vector<64x128xf32>
    %c0_12 = arith.constant 0 : index
    %c0_13 = arith.constant 0 : index
    %8 = vector.load %arg4[%c0_12, %c0_13] : memref<1x128xf32, #tpu.memory_space<vmem>>, vector<1x128xf32>
    %9 = vector.broadcast %8 : vector<1x128xf32> to vector<64x128xf32>
    %10 = arith.addf %7, %9 : vector<64x128xf32>
    %c0_14 = arith.constant 0 : index
    %c0_15 = arith.constant 0 : index
    %11 = vector.load %arg9[%c0_14, %c0_15] : memref<64x128xf32, #tpu.memory_space<vmem>>, vector<64x128xf32>
    tpu.vector_store %arg9[%c0_14, %c0_15], %10 {strides = array<i32>} : memref<64x128xf32, #tpu.memory_space<vmem>>, vector<64x128xf32>,
    %cst_16 = arith.constant 0.000000e+00 : f32
    %12 = vector.broadcast %cst_16 : f32 to vector<8x32xf32>
    %cst_17 = arith.constant 0.000000e+00 : f32
    %13 = vector.broadcast %cst_17 : f32 to vector<8x32xf32>
    %c0_i32 = arith.constant 0 : i32
    %14 = arith.truncf %12 : vector<8x32xf32> to vector<8x32xbf16>
    %cst_18 = arith.constant dense<0.000000e+00> : vector<8x256xf32>
    %15 = tpu.matmul %14, %0, %cst_18 {dimension_numbers = #tpu.dot_dimension_numbers<[1], [0], [0], [1], [0, 0, 1, 1], [], []>} : vector<8x32xbf16>, vector<32x256xbf16>, vector<8x256xf32> -> vector<8x256xf32>
    %c8_i32 = arith.constant 8 : i32
    %16 = arith.muli %c0_i32, %c8_i32 : i32
    %17 = tpu.assume_multiple %16, 8 : i32
    %18 = arith.index_cast %17 : i32 to index
    %c0_19 = arith.constant 0 : index
    %19 = vector.load %arg9[%18, %c0_19] : memref<64x128xf32, #tpu.memory_space<vmem>>, vector<8x128xf32>
    %20 = vector.extract_strided_slice %15 {offsets = [0, 0], sizes = [8, 128], strides = [1, 1]} : vector<8x256xf32> to vector<8x128xf32>
    %21 = arith.addf %19, %20 : vector<8x128xf32>
    %c0_i32_20 = arith.constant 0 : i32
    %22 = arith.cmpi sgt, %c0_i32, %c0_i32_20 : i32
    %23 = arith.extui %22 : i1 to i32
    %c0_i32_21 = arith.constant 0 : i32
    %24 = arith.cmpi ne, %23, %c0_i32_21 : i32
    scf.if %24 {
      %c1_i32_128 = arith.constant 1 : i32
      %444 = arith.subi %c0_i32, %c1_i32_128 : i32
      %445 = vector.extract_strided_slice %15 {offsets = [0, 128], sizes = [8, 128], strides = [1, 1]} : vector<8x256xf32> to vector<8x128xf32>
      %446 = vector.broadcast %2 : vector<1x128xf32> to vector<8x128xf32>
      %447 = arith.addf %445, %446 : vector<8x128xf32>
      %c8_i32_129 = arith.constant 8 : i32
      %448 = arith.muli %444, %c8_i32_129 : i32
      %449 = tpu.assume_multiple %448, 8 : i32
      %450 = arith.index_cast %449 : i32 to index
      %c0_130 = arith.constant 0 : index
      %451 = vector.load %arg9[%450, %c0_130] : memref<64x128xf32, #tpu.memory_space<vmem>>, vector<8x128xf32>
      tpu.vector_store %arg9[%450, %c0_130], %447 {strides = array<i32>} : memref<64x128xf32, #tpu.memory_space<vmem>>, vector<8x128xf32>,
    } else {
    }
    %25 = arith.negf %21 : vector<8x128xf32>
    %26 = math.exp %25 : vector<8x128xf32>
    %cst_22 = arith.constant 1.000000e+00 : f32
    %27 = vector.broadcast %cst_22 : f32 to vector<8x128xf32>
    %28 = arith.addf %27, %26 : vector<8x128xf32>
    %29 = arith.divf %27, %28 : vector<8x128xf32>
    %30 = vector.extract_strided_slice %29 {offsets = [0, 0], sizes = [8, 32], strides = [1, 1]} : vector<8x128xf32> to vector<8x32xf32>
    %31 = vector.extract_strided_slice %29 {offsets = [0, 32], sizes = [8, 32], strides = [1, 1]} : vector<8x128xf32> to vector<8x32xf32>
    %32 = vector.extract_strided_slice %29 {offsets = [0, 96], sizes = [8, 32], strides = [1, 1]} : vector<8x128xf32> to vector<8x32xf32>
    %33 = vector.extract_strided_slice %21 {offsets = [0, 64], sizes = [8, 32], strides = [1, 1]} : vector<8x128xf32> to vector<8x32xf32>
    %34 = math.tanh %33 : vector<8x32xf32>
    %35 = arith.mulf %31, %13 : vector<8x32xf32>
    %36 = arith.mulf %30, %34 : vector<8x32xf32>
    %37 = arith.addf %35, %36 : vector<8x32xf32>
    %38 = math.tanh %37 : vector<8x32xf32>
    %39 = arith.mulf %32, %38 : vector<8x32xf32>
    %c1_i32 = arith.constant 1 : i32
    %40 = arith.truncf %39 : vector<8x32xf32> to vector<8x32xbf16>
    %cst_23 = arith.constant dense<0.000000e+00> : vector<8x256xf32>
    %41 = tpu.matmul %40, %0, %cst_23 {dimension_numbers = #tpu.dot_dimension_numbers<[1], [0], [0], [1], [0, 0, 1, 1], [], []>} : vector<8x32xbf16>, vector<32x256xbf16>, vector<8x256xf32> -> vector<8x256xf32>
    %c8_i32_24 = arith.constant 8 : i32
    %42 = arith.muli %c1_i32, %c8_i32_24 : i32
    %43 = tpu.assume_multiple %42, 8 : i32
    %44 = arith.index_cast %43 : i32 to index
    %c0_25 = arith.constant 0 : index
    %45 = vector.load %arg9[%44, %c0_25] : memref<64x128xf32, #tpu.memory_space<vmem>>, vector<8x128xf32>
    %46 = vector.extract_strided_slice %41 {offsets = [0, 0], sizes = [8, 128], strides = [1, 1]} : vector<8x256xf32> to vector<8x128xf32>
    %47 = arith.addf %45, %46 : vector<8x128xf32>
    %c0_i32_26 = arith.constant 0 : i32
    %48 = arith.cmpi sgt, %c1_i32, %c0_i32_26 : i32
    %49 = arith.extui %48 : i1 to i32
    %c0_i32_27 = arith.constant 0 : i32
    %50 = arith.cmpi ne, %49, %c0_i32_27 : i32
    scf.if %50 {
      %c1_i32_128 = arith.constant 1 : i32
      %444 = arith.subi %c1_i32, %c1_i32_128 : i32
      %445 = vector.extract_strided_slice %41 {offsets = [0, 128], sizes = [8, 128], strides = [1, 1]} : vector<8x256xf32> to vector<8x128xf32>
      %446 = vector.broadcast %2 : vector<1x128xf32> to vector<8x128xf32>
      %447 = arith.addf %445, %446 : vector<8x128xf32>
      %c8_i32_129 = arith.constant 8 : i32
      %448 = arith.muli %444, %c8_i32_129 : i32
      %449 = tpu.assume_multiple %448, 8 : i32
      %450 = arith.index_cast %449 : i32 to index
      %c0_130 = arith.constant 0 : index
      %451 = vector.load %arg9[%450, %c0_130] : memref<64x128xf32, #tpu.memory_space<vmem>>, vector<8x128xf32>
      tpu.vector_store %arg9[%450, %c0_130], %447 {strides = array<i32>} : memref<64x128xf32, #tpu.memory_space<vmem>>, vector<8x128xf32>,
    } else {
    }
    %51 = arith.negf %47 : vector<8x128xf32>
    %52 = math.exp %51 : vector<8x128xf32>
    %cst_28 = arith.constant 1.000000e+00 : f32
    %53 = vector.broadcast %cst_28 : f32 to vector<8x128xf32>
    %54 = arith.addf %53, %52 : vector<8x128xf32>
    %55 = arith.divf %53, %54 : vector<8x128xf32>
    %56 = vector.extract_strided_slice %55 {offsets = [0, 0], sizes = [8, 32], strides = [1, 1]} : vector<8x128xf32> to vector<8x32xf32>
    %57 = vector.extract_strided_slice %55 {offsets = [0, 32], sizes = [8, 32], strides = [1, 1]} : vector<8x128xf32> to vector<8x32xf32>
    %58 = vector.extract_strided_slice %55 {offsets = [0, 96], sizes = [8, 32], strides = [1, 1]} : vector<8x128xf32> to vector<8x32xf32>
    %59 = vector.extract_strided_slice %47 {offsets = [0, 64], sizes = [8, 32], strides = [1, 1]} : vector<8x128xf32> to vector<8x32xf32>
    %60 = math.tanh %59 : vector<8x32xf32>
    %61 = arith.mulf %57, %37 : vector<8x32xf32>
    %62 = arith.mulf %56, %60 : vector<8x32xf32>
    %63 = arith.addf %61, %62 : vector<8x32xf32>
    %64 = math.tanh %63 : vector<8x32xf32>
    %65 = arith.mulf %58, %64 : vector<8x32xf32>
    %c2_i32 = arith.constant 2 : i32
    %66 = arith.truncf %65 : vector<8x32xf32> to vector<8x32xbf16>
    %cst_29 = arith.constant dense<0.000000e+00> : vector<8x256xf32>
    %67 = tpu.matmul %66, %0, %cst_29 {dimension_numbers = #tpu.dot_dimension_numbers<[1], [0], [0], [1], [0, 0, 1, 1], [], []>} : vector<8x32xbf16>, vector<32x256xbf16>, vector<8x256xf32> -> vector<8x256xf32>
    %c8_i32_30 = arith.constant 8 : i32
    %68 = arith.muli %c2_i32, %c8_i32_30 : i32
    %69 = tpu.assume_multiple %68, 8 : i32
    %70 = arith.index_cast %69 : i32 to index
    %c0_31 = arith.constant 0 : index
    %71 = vector.load %arg9[%70, %c0_31] : memref<64x128xf32, #tpu.memory_space<vmem>>, vector<8x128xf32>
    %72 = vector.extract_strided_slice %67 {offsets = [0, 0], sizes = [8, 128], strides = [1, 1]} : vector<8x256xf32> to vector<8x128xf32>
    %73 = arith.addf %71, %72 : vector<8x128xf32>
    %c0_i32_32 = arith.constant 0 : i32
    %74 = arith.cmpi sgt, %c2_i32, %c0_i32_32 : i32
    %75 = arith.extui %74 : i1 to i32
    %c0_i32_33 = arith.constant 0 : i32
    %76 = arith.cmpi ne, %75, %c0_i32_33 : i32
    scf.if %76 {
      %c1_i32_128 = arith.constant 1 : i32
      %444 = arith.subi %c2_i32, %c1_i32_128 : i32
      %445 = vector.extract_strided_slice %67 {offsets = [0, 128], sizes = [8, 128], strides = [1, 1]} : vector<8x256xf32> to vector<8x128xf32>
      %446 = vector.broadcast %2 : vector<1x128xf32> to vector<8x128xf32>
      %447 = arith.addf %445, %446 : vector<8x128xf32>
      %c8_i32_129 = arith.constant 8 : i32
      %448 = arith.muli %444, %c8_i32_129 : i32
      %449 = tpu.assume_multiple %448, 8 : i32
      %450 = arith.index_cast %449 : i32 to index
      %c0_130 = arith.constant 0 : index
      %451 = vector.load %arg9[%450, %c0_130] : memref<64x128xf32, #tpu.memory_space<vmem>>, vector<8x128xf32>
      tpu.vector_store %arg9[%450, %c0_130], %447 {strides = array<i32>} : memref<64x128xf32, #tpu.memory_space<vmem>>, vector<8x128xf32>,
    } else {
    }
    %77 = arith.negf %73 : vector<8x128xf32>
    %78 = math.exp %77 : vector<8x128xf32>
    %cst_34 = arith.constant 1.000000e+00 : f32
    %79 = vector.broadcast %cst_34 : f32 to vector<8x128xf32>
    %80 = arith.addf %79, %78 : vector<8x128xf32>
    %81 = arith.divf %79, %80 : vector<8x128xf32>
    %82 = vector.extract_strided_slice %81 {offsets = [0, 0], sizes = [8, 32], strides = [1, 1]} : vector<8x128xf32> to vector<8x32xf32>
    %83 = vector.extract_strided_slice %81 {offsets = [0, 32], sizes = [8, 32], strides = [1, 1]} : vector<8x128xf32> to vector<8x32xf32>
    %84 = vector.extract_strided_slice %81 {offsets = [0, 96], sizes = [8, 32], strides = [1, 1]} : vector<8x128xf32> to vector<8x32xf32>
    %85 = vector.extract_strided_slice %73 {offsets = [0, 64], sizes = [8, 32], strides = [1, 1]} : vector<8x128xf32> to vector<8x32xf32>
    %86 = math.tanh %85 : vector<8x32xf32>
    %87 = arith.mulf %83, %63 : vector<8x32xf32>
    %88 = arith.mulf %82, %86 : vector<8x32xf32>
    %89 = arith.addf %87, %88 : vector<8x32xf32>
    %90 = math.tanh %89 : vector<8x32xf32>
    %91 = arith.mulf %84, %90 : vector<8x32xf32>
    %c3_i32 = arith.constant 3 : i32
    %92 = arith.truncf %91 : vector<8x32xf32> to vector<8x32xbf16>
    %cst_35 = arith.constant dense<0.000000e+00> : vector<8x256xf32>
    %93 = tpu.matmul %92, %0, %cst_35 {dimension_numbers = #tpu.dot_dimension_numbers<[1], [0], [0], [1], [0, 0, 1, 1], [], []>} : vector<8x32xbf16>, vector<32x256xbf16>, vector<8x256xf32> -> vector<8x256xf32>
    %c8_i32_36 = arith.constant 8 : i32
    %94 = arith.muli %c3_i32, %c8_i32_36 : i32
    %95 = tpu.assume_multiple %94, 8 : i32
    %96 = arith.index_cast %95 : i32 to index
    %c0_37 = arith.constant 0 : index
    %97 = vector.load %arg9[%96, %c0_37] : memref<64x128xf32, #tpu.memory_space<vmem>>, vector<8x128xf32>
    %98 = vector.extract_strided_slice %93 {offsets = [0, 0], sizes = [8, 128], strides = [1, 1]} : vector<8x256xf32> to vector<8x128xf32>
    %99 = arith.addf %97, %98 : vector<8x128xf32>
    %c0_i32_38 = arith.constant 0 : i32
    %100 = arith.cmpi sgt, %c3_i32, %c0_i32_38 : i32
    %101 = arith.extui %100 : i1 to i32
    %c0_i32_39 = arith.constant 0 : i32
    %102 = arith.cmpi ne, %101, %c0_i32_39 : i32
    scf.if %102 {
      %c1_i32_128 = arith.constant 1 : i32
      %444 = arith.subi %c3_i32, %c1_i32_128 : i32
      %445 = vector.extract_strided_slice %93 {offsets = [0, 128], sizes = [8, 128], strides = [1, 1]} : vector<8x256xf32> to vector<8x128xf32>
      %446 = vector.broadcast %2 : vector<1x128xf32> to vector<8x128xf32>
      %447 = arith.addf %445, %446 : vector<8x128xf32>
      %c8_i32_129 = arith.constant 8 : i32
      %448 = arith.muli %444, %c8_i32_129 : i32
      %449 = tpu.assume_multiple %448, 8 : i32
      %450 = arith.index_cast %449 : i32 to index
      %c0_130 = arith.constant 0 : index
      %451 = vector.load %arg9[%450, %c0_130] : memref<64x128xf32, #tpu.memory_space<vmem>>, vector<8x128xf32>
      tpu.vector_store %arg9[%450, %c0_130], %447 {strides = array<i32>} : memref<64x128xf32, #tpu.memory_space<vmem>>, vector<8x128xf32>,
    } else {
    }
    %103 = arith.negf %99 : vector<8x128xf32>
    %104 = math.exp %103 : vector<8x128xf32>
    %cst_40 = arith.constant 1.000000e+00 : f32
    %105 = vector.broadcast %cst_40 : f32 to vector<8x128xf32>
    %106 = arith.addf %105, %104 : vector<8x128xf32>
    %107 = arith.divf %105, %106 : vector<8x128xf32>
    %108 = vector.extract_strided_slice %107 {offsets = [0, 0], sizes = [8, 32], strides = [1, 1]} : vector<8x128xf32> to vector<8x32xf32>
    %109 = vector.extract_strided_slice %107 {offsets = [0, 32], sizes = [8, 32], strides = [1, 1]} : vector<8x128xf32> to vector<8x32xf32>
    %110 = vector.extract_strided_slice %107 {offsets = [0, 96], sizes = [8, 32], strides = [1, 1]} : vector<8x128xf32> to vector<8x32xf32>
    %111 = vector.extract_strided_slice %99 {offsets = [0, 64], sizes = [8, 32], strides = [1, 1]} : vector<8x128xf32> to vector<8x32xf32>
    %112 = math.tanh %111 : vector<8x32xf32>
    %113 = arith.mulf %109, %89 : vector<8x32xf32>
    %114 = arith.mulf %108, %112 : vector<8x32xf32>
    %115 = arith.addf %113, %114 : vector<8x32xf32>
    %116 = math.tanh %115 : vector<8x32xf32>
    %117 = arith.mulf %110, %116 : vector<8x32xf32>
    %c4_i32 = arith.constant 4 : i32
    %118 = arith.truncf %117 : vector<8x32xf32> to vector<8x32xbf16>
    %cst_41 = arith.constant dense<0.000000e+00> : vector<8x256xf32>
    %119 = tpu.matmul %118, %0, %cst_41 {dimension_numbers = #tpu.dot_dimension_numbers<[1], [0], [0], [1], [0, 0, 1, 1], [], []>} : vector<8x32xbf16>, vector<32x256xbf16>, vector<8x256xf32> -> vector<8x256xf32>
    %c8_i32_42 = arith.constant 8 : i32
    %120 = arith.muli %c4_i32, %c8_i32_42 : i32
    %121 = tpu.assume_multiple %120, 8 : i32
    %122 = arith.index_cast %121 : i32 to index
    %c0_43 = arith.constant 0 : index
    %123 = vector.load %arg9[%122, %c0_43] : memref<64x128xf32, #tpu.memory_space<vmem>>, vector<8x128xf32>
    %124 = vector.extract_strided_slice %119 {offsets = [0, 0], sizes = [8, 128], strides = [1, 1]} : vector<8x256xf32> to vector<8x128xf32>
    %125 = arith.addf %123, %124 : vector<8x128xf32>
    %c0_i32_44 = arith.constant 0 : i32
    %126 = arith.cmpi sgt, %c4_i32, %c0_i32_44 : i32
    %127 = arith.extui %126 : i1 to i32
    %c0_i32_45 = arith.constant 0 : i32
    %128 = arith.cmpi ne, %127, %c0_i32_45 : i32
    scf.if %128 {
      %c1_i32_128 = arith.constant 1 : i32
      %444 = arith.subi %c4_i32, %c1_i32_128 : i32
      %445 = vector.extract_strided_slice %119 {offsets = [0, 128], sizes = [8, 128], strides = [1, 1]} : vector<8x256xf32> to vector<8x128xf32>
      %446 = vector.broadcast %2 : vector<1x128xf32> to vector<8x128xf32>
      %447 = arith.addf %445, %446 : vector<8x128xf32>
      %c8_i32_129 = arith.constant 8 : i32
      %448 = arith.muli %444, %c8_i32_129 : i32
      %449 = tpu.assume_multiple %448, 8 : i32
      %450 = arith.index_cast %449 : i32 to index
      %c0_130 = arith.constant 0 : index
      %451 = vector.load %arg9[%450, %c0_130] : memref<64x128xf32, #tpu.memory_space<vmem>>, vector<8x128xf32>
      tpu.vector_store %arg9[%450, %c0_130], %447 {strides = array<i32>} : memref<64x128xf32, #tpu.memory_space<vmem>>, vector<8x128xf32>,
    } else {
    }
    %129 = arith.negf %125 : vector<8x128xf32>
    %130 = math.exp %129 : vector<8x128xf32>
    %cst_46 = arith.constant 1.000000e+00 : f32
    %131 = vector.broadcast %cst_46 : f32 to vector<8x128xf32>
    %132 = arith.addf %131, %130 : vector<8x128xf32>
    %133 = arith.divf %131, %132 : vector<8x128xf32>
    %134 = vector.extract_strided_slice %133 {offsets = [0, 0], sizes = [8, 32], strides = [1, 1]} : vector<8x128xf32> to vector<8x32xf32>
    %135 = vector.extract_strided_slice %133 {offsets = [0, 32], sizes = [8, 32], strides = [1, 1]} : vector<8x128xf32> to vector<8x32xf32>
    %136 = vector.extract_strided_slice %133 {offsets = [0, 96], sizes = [8, 32], strides = [1, 1]} : vector<8x128xf32> to vector<8x32xf32>
    %137 = vector.extract_strided_slice %125 {offsets = [0, 64], sizes = [8, 32], strides = [1, 1]} : vector<8x128xf32> to vector<8x32xf32>
    %138 = math.tanh %137 : vector<8x32xf32>
    %139 = arith.mulf %135, %115 : vector<8x32xf32>
    %140 = arith.mulf %134, %138 : vector<8x32xf32>
    %141 = arith.addf %139, %140 : vector<8x32xf32>
    %142 = math.tanh %141 : vector<8x32xf32>
    %143 = arith.mulf %136, %142 : vector<8x32xf32>
    %c5_i32 = arith.constant 5 : i32
    %144 = arith.truncf %143 : vector<8x32xf32> to vector<8x32xbf16>
    %cst_47 = arith.constant dense<0.000000e+00> : vector<8x256xf32>
    %145 = tpu.matmul %144, %0, %cst_47 {dimension_numbers = #tpu.dot_dimension_numbers<[1], [0], [0], [1], [0, 0, 1, 1], [], []>} : vector<8x32xbf16>, vector<32x256xbf16>, vector<8x256xf32> -> vector<8x256xf32>
    %c8_i32_48 = arith.constant 8 : i32
    %146 = arith.muli %c5_i32, %c8_i32_48 : i32
    %147 = tpu.assume_multiple %146, 8 : i32
    %148 = arith.index_cast %147 : i32 to index
    %c0_49 = arith.constant 0 : index
    %149 = vector.load %arg9[%148, %c0_49] : memref<64x128xf32, #tpu.memory_space<vmem>>, vector<8x128xf32>
    %150 = vector.extract_strided_slice %145 {offsets = [0, 0], sizes = [8, 128], strides = [1, 1]} : vector<8x256xf32> to vector<8x128xf32>
    %151 = arith.addf %149, %150 : vector<8x128xf32>
    %c0_i32_50 = arith.constant 0 : i32
    %152 = arith.cmpi sgt, %c5_i32, %c0_i32_50 : i32
    %153 = arith.extui %152 : i1 to i32
    %c0_i32_51 = arith.constant 0 : i32
    %154 = arith.cmpi ne, %153, %c0_i32_51 : i32
    scf.if %154 {
      %c1_i32_128 = arith.constant 1 : i32
      %444 = arith.subi %c5_i32, %c1_i32_128 : i32
      %445 = vector.extract_strided_slice %145 {offsets = [0, 128], sizes = [8, 128], strides = [1, 1]} : vector<8x256xf32> to vector<8x128xf32>
      %446 = vector.broadcast %2 : vector<1x128xf32> to vector<8x128xf32>
      %447 = arith.addf %445, %446 : vector<8x128xf32>
      %c8_i32_129 = arith.constant 8 : i32
      %448 = arith.muli %444, %c8_i32_129 : i32
      %449 = tpu.assume_multiple %448, 8 : i32
      %450 = arith.index_cast %449 : i32 to index
      %c0_130 = arith.constant 0 : index
      %451 = vector.load %arg9[%450, %c0_130] : memref<64x128xf32, #tpu.memory_space<vmem>>, vector<8x128xf32>
      tpu.vector_store %arg9[%450, %c0_130], %447 {strides = array<i32>} : memref<64x128xf32, #tpu.memory_space<vmem>>, vector<8x128xf32>,
    } else {
    }
    %155 = arith.negf %151 : vector<8x128xf32>
    %156 = math.exp %155 : vector<8x128xf32>
    %cst_52 = arith.constant 1.000000e+00 : f32
    %157 = vector.broadcast %cst_52 : f32 to vector<8x128xf32>
    %158 = arith.addf %157, %156 : vector<8x128xf32>
    %159 = arith.divf %157, %158 : vector<8x128xf32>
    %160 = vector.extract_strided_slice %159 {offsets = [0, 0], sizes = [8, 32], strides = [1, 1]} : vector<8x128xf32> to vector<8x32xf32>
    %161 = vector.extract_strided_slice %159 {offsets = [0, 32], sizes = [8, 32], strides = [1, 1]} : vector<8x128xf32> to vector<8x32xf32>
    %162 = vector.extract_strided_slice %159 {offsets = [0, 96], sizes = [8, 32], strides = [1, 1]} : vector<8x128xf32> to vector<8x32xf32>
    %163 = vector.extract_strided_slice %151 {offsets = [0, 64], sizes = [8, 32], strides = [1, 1]} : vector<8x128xf32> to vector<8x32xf32>
    %164 = math.tanh %163 : vector<8x32xf32>
    %165 = arith.mulf %161, %141 : vector<8x32xf32>
    %166 = arith.mulf %160, %164 : vector<8x32xf32>
    %167 = arith.addf %165, %166 : vector<8x32xf32>
    %168 = math.tanh %167 : vector<8x32xf32>
    %169 = arith.mulf %162, %168 : vector<8x32xf32>
    %c6_i32 = arith.constant 6 : i32
    %170 = arith.truncf %169 : vector<8x32xf32> to vector<8x32xbf16>
    %cst_53 = arith.constant dense<0.000000e+00> : vector<8x256xf32>
    %171 = tpu.matmul %170, %0, %cst_53 {dimension_numbers = #tpu.dot_dimension_numbers<[1], [0], [0], [1], [0, 0, 1, 1], [], []>} : vector<8x32xbf16>, vector<32x256xbf16>, vector<8x256xf32> -> vector<8x256xf32>
    %c8_i32_54 = arith.constant 8 : i32
    %172 = arith.muli %c6_i32, %c8_i32_54 : i32
    %173 = tpu.assume_multiple %172, 8 : i32
    %174 = arith.index_cast %173 : i32 to index
    %c0_55 = arith.constant 0 : index
    %175 = vector.load %arg9[%174, %c0_55] : memref<64x128xf32, #tpu.memory_space<vmem>>, vector<8x128xf32>
    %176 = vector.extract_strided_slice %171 {offsets = [0, 0], sizes = [8, 128], strides = [1, 1]} : vector<8x256xf32> to vector<8x128xf32>
    %177 = arith.addf %175, %176 : vector<8x128xf32>
    %c0_i32_56 = arith.constant 0 : i32
    %178 = arith.cmpi sgt, %c6_i32, %c0_i32_56 : i32
    %179 = arith.extui %178 : i1 to i32
    %c0_i32_57 = arith.constant 0 : i32
    %180 = arith.cmpi ne, %179, %c0_i32_57 : i32
    scf.if %180 {
      %c1_i32_128 = arith.constant 1 : i32
      %444 = arith.subi %c6_i32, %c1_i32_128 : i32
      %445 = vector.extract_strided_slice %171 {offsets = [0, 128], sizes = [8, 128], strides = [1, 1]} : vector<8x256xf32> to vector<8x128xf32>
      %446 = vector.broadcast %2 : vector<1x128xf32> to vector<8x128xf32>
      %447 = arith.addf %445, %446 : vector<8x128xf32>
      %c8_i32_129 = arith.constant 8 : i32
      %448 = arith.muli %444, %c8_i32_129 : i32
      %449 = tpu.assume_multiple %448, 8 : i32
      %450 = arith.index_cast %449 : i32 to index
      %c0_130 = arith.constant 0 : index
      %451 = vector.load %arg9[%450, %c0_130] : memref<64x128xf32, #tpu.memory_space<vmem>>, vector<8x128xf32>
      tpu.vector_store %arg9[%450, %c0_130], %447 {strides = array<i32>} : memref<64x128xf32, #tpu.memory_space<vmem>>, vector<8x128xf32>,
    } else {
    }
    %181 = arith.negf %177 : vector<8x128xf32>
    %182 = math.exp %181 : vector<8x128xf32>
    %cst_58 = arith.constant 1.000000e+00 : f32
    %183 = vector.broadcast %cst_58 : f32 to vector<8x128xf32>
    %184 = arith.addf %183, %182 : vector<8x128xf32>
    %185 = arith.divf %183, %184 : vector<8x128xf32>
    %186 = vector.extract_strided_slice %185 {offsets = [0, 0], sizes = [8, 32], strides = [1, 1]} : vector<8x128xf32> to vector<8x32xf32>
    %187 = vector.extract_strided_slice %185 {offsets = [0, 32], sizes = [8, 32], strides = [1, 1]} : vector<8x128xf32> to vector<8x32xf32>
    %188 = vector.extract_strided_slice %185 {offsets = [0, 96], sizes = [8, 32], strides = [1, 1]} : vector<8x128xf32> to vector<8x32xf32>
    %189 = vector.extract_strided_slice %177 {offsets = [0, 64], sizes = [8, 32], strides = [1, 1]} : vector<8x128xf32> to vector<8x32xf32>
    %190 = math.tanh %189 : vector<8x32xf32>
    %191 = arith.mulf %187, %167 : vector<8x32xf32>
    %192 = arith.mulf %186, %190 : vector<8x32xf32>
    %193 = arith.addf %191, %192 : vector<8x32xf32>
    %194 = math.tanh %193 : vector<8x32xf32>
    %195 = arith.mulf %188, %194 : vector<8x32xf32>
    %c7_i32 = arith.constant 7 : i32
    %196 = arith.truncf %195 : vector<8x32xf32> to vector<8x32xbf16>
    %cst_59 = arith.constant dense<0.000000e+00> : vector<8x256xf32>
    %197 = tpu.matmul %196, %0, %cst_59 {dimension_numbers = #tpu.dot_dimension_numbers<[1], [0], [0], [1], [0, 0, 1, 1], [], []>} : vector<8x32xbf16>, vector<32x256xbf16>, vector<8x256xf32> -> vector<8x256xf32>
    %c8_i32_60 = arith.constant 8 : i32
    %198 = arith.muli %c7_i32, %c8_i32_60 : i32
    %199 = tpu.assume_multiple %198, 8 : i32
    %200 = arith.index_cast %199 : i32 to index
    %c0_61 = arith.constant 0 : index
    %201 = vector.load %arg9[%200, %c0_61] : memref<64x128xf32, #tpu.memory_space<vmem>>, vector<8x128xf32>
    %202 = vector.extract_strided_slice %197 {offsets = [0, 0], sizes = [8, 128], strides = [1, 1]} : vector<8x256xf32> to vector<8x128xf32>
    %203 = arith.addf %201, %202 : vector<8x128xf32>
    %c0_i32_62 = arith.constant 0 : i32
    %204 = arith.cmpi sgt, %c7_i32, %c0_i32_62 : i32
    %205 = arith.extui %204 : i1 to i32
    %c0_i32_63 = arith.constant 0 : i32
    %206 = arith.cmpi ne, %205, %c0_i32_63 : i32
    scf.if %206 {
      %c1_i32_128 = arith.constant 1 : i32
      %444 = arith.subi %c7_i32, %c1_i32_128 : i32
      %445 = vector.extract_strided_slice %197 {offsets = [0, 128], sizes = [8, 128], strides = [1, 1]} : vector<8x256xf32> to vector<8x128xf32>
      %446 = vector.broadcast %2 : vector<1x128xf32> to vector<8x128xf32>
      %447 = arith.addf %445, %446 : vector<8x128xf32>
      %c8_i32_129 = arith.constant 8 : i32
      %448 = arith.muli %444, %c8_i32_129 : i32
      %449 = tpu.assume_multiple %448, 8 : i32
      %450 = arith.index_cast %449 : i32 to index
      %c0_130 = arith.constant 0 : index
      %451 = vector.load %arg9[%450, %c0_130] : memref<64x128xf32, #tpu.memory_space<vmem>>, vector<8x128xf32>
      tpu.vector_store %arg9[%450, %c0_130], %447 {strides = array<i32>} : memref<64x128xf32, #tpu.memory_space<vmem>>, vector<8x128xf32>,
    } else {
    }
    %207 = arith.negf %203 : vector<8x128xf32>
    %208 = math.exp %207 : vector<8x128xf32>
    %cst_64 = arith.constant 1.000000e+00 : f32
    %209 = vector.broadcast %cst_64 : f32 to vector<8x128xf32>
    %210 = arith.addf %209, %208 : vector<8x128xf32>
    %211 = arith.divf %209, %210 : vector<8x128xf32>
    %212 = vector.extract_strided_slice %211 {offsets = [0, 0], sizes = [8, 32], strides = [1, 1]} : vector<8x128xf32> to vector<8x32xf32>
    %213 = vector.extract_strided_slice %211 {offsets = [0, 32], sizes = [8, 32], strides = [1, 1]} : vector<8x128xf32> to vector<8x32xf32>
    %214 = vector.extract_strided_slice %211 {offsets = [0, 96], sizes = [8, 32], strides = [1, 1]} : vector<8x128xf32> to vector<8x32xf32>
    %215 = vector.extract_strided_slice %203 {offsets = [0, 64], sizes = [8, 32], strides = [1, 1]} : vector<8x128xf32> to vector<8x32xf32>
    %216 = math.tanh %215 : vector<8x32xf32>
    %217 = arith.mulf %213, %193 : vector<8x32xf32>
    %218 = arith.mulf %212, %216 : vector<8x32xf32>
    %219 = arith.addf %217, %218 : vector<8x32xf32>
    %220 = math.tanh %219 : vector<8x32xf32>
    %221 = arith.mulf %214, %220 : vector<8x32xf32>
    %c8_i32_65 = arith.constant 8 : i32
    %222 = arith.truncf %221 : vector<8x32xf32> to vector<8x32xbf16>
    %223 = vector.extract_strided_slice %0 {offsets = [0, 128], sizes = [32, 128], strides = [1, 1]} : vector<32x256xbf16> to vector<32x128xbf16>
    %cst_66 = arith.constant dense<0.000000e+00> : vector<8x128xf32>
    %224 = tpu.matmul %222, %223, %cst_66 {dimension_numbers = #tpu.dot_dimension_numbers<[1], [0], [0], [1], [0, 0, 1, 1], [], []>} : vector<8x32xbf16>, vector<32x128xbf16>, vector<8x128xf32> -> vector<8x128xf32>
    %225 = vector.broadcast %2 : vector<1x128xf32> to vector<8x128xf32>
    %226 = arith.addf %224, %225 : vector<8x128xf32>
    %c56 = arith.constant 56 : index
    %c0_67 = arith.constant 0 : index
    %227 = vector.load %arg9[%c56, %c0_67] : memref<64x128xf32, #tpu.memory_space<vmem>>, vector<8x128xf32>
    tpu.vector_store %arg9[%c56, %c0_67], %226 {strides = array<i32>} : memref<64x128xf32, #tpu.memory_space<vmem>>, vector<8x128xf32>,
    %c0_i32_68 = arith.constant 0 : i32
    %228 = arith.truncf %221 : vector<8x32xf32> to vector<8x32xbf16>
    %cst_69 = arith.constant dense<0.000000e+00> : vector<8x160xf32>
    %229 = tpu.matmul %228, %1, %cst_69 {dimension_numbers = #tpu.dot_dimension_numbers<[1], [0], [0], [1], [0, 0, 1, 1], [], []>} : vector<8x32xbf16>, vector<32x160xbf16>, vector<8x160xf32> -> vector<8x160xf32>
    %c8_i32_70 = arith.constant 8 : i32
    %230 = arith.muli %c0_i32_68, %c8_i32_70 : i32
    %231 = tpu.assume_multiple %230, 8 : i32
    %232 = arith.index_cast %231 : i32 to index
    %c0_71 = arith.constant 0 : index
    %233 = vector.load %arg9[%232, %c0_71] : memref<64x128xf32, #tpu.memory_space<vmem>>, vector<8x128xf32>
    %234 = vector.extract_strided_slice %229 {offsets = [0, 0], sizes = [8, 128], strides = [1, 1]} : vector<8x160xf32> to vector<8x128xf32>
    %235 = arith.addf %233, %234 : vector<8x128xf32>
    %c0_i32_72 = arith.constant 0 : i32
    %236 = arith.cmpi sgt, %c0_i32_68, %c0_i32_72 : i32
    %237 = arith.extui %236 : i1 to i32
    %c0_i32_73 = arith.constant 0 : i32
    %238 = arith.cmpi ne, %237, %c0_i32_73 : i32
    scf.if %238 {
      %c1_i32_128 = arith.constant 1 : i32
      %444 = arith.subi %c0_i32_68, %c1_i32_128 : i32
      %445 = vector.extract_strided_slice %229 {offsets = [0, 128], sizes = [8, 32], strides = [1, 1]} : vector<8x160xf32> to vector<8x32xf32>
      %446 = vector.broadcast %3 : vector<1x32xf32> to vector<8x32xf32>
      %447 = arith.addf %445, %446 : vector<8x32xf32>
      %448 = arith.index_cast %444 : i32 to index
      %c0_129 = arith.constant 0 : index
      %c0_130 = arith.constant 0 : index
      %449 = vector.load %arg8[%448, %c0_129, %c0_130] : memref<8x8x32xf32, #tpu.memory_space<vmem>>, vector<1x8x32xf32>
      %450 = vector.shape_cast %449 : vector<1x8x32xf32> to vector<8x32xf32>
      %451 = vector.shape_cast %447 : vector<8x32xf32> to vector<1x8x32xf32>
      tpu.vector_store %arg8[%448, %c0_129, %c0_130], %451 {strides = array<i32>} : memref<8x8x32xf32, #tpu.memory_space<vmem>>, vector<1x8x32xf32>,
    } else {
    }
    %239 = arith.negf %235 : vector<8x128xf32>
    %240 = math.exp %239 : vector<8x128xf32>
    %cst_74 = arith.constant 1.000000e+00 : f32
    %241 = vector.broadcast %cst_74 : f32 to vector<8x128xf32>
    %242 = arith.addf %241, %240 : vector<8x128xf32>
    %243 = arith.divf %241, %242 : vector<8x128xf32>
    %244 = vector.extract_strided_slice %243 {offsets = [0, 0], sizes = [8, 32], strides = [1, 1]} : vector<8x128xf32> to vector<8x32xf32>
    %245 = vector.extract_strided_slice %243 {offsets = [0, 32], sizes = [8, 32], strides = [1, 1]} : vector<8x128xf32> to vector<8x32xf32>
    %246 = vector.extract_strided_slice %243 {offsets = [0, 96], sizes = [8, 32], strides = [1, 1]} : vector<8x128xf32> to vector<8x32xf32>
    %247 = vector.extract_strided_slice %235 {offsets = [0, 64], sizes = [8, 32], strides = [1, 1]} : vector<8x128xf32> to vector<8x32xf32>
    %248 = math.tanh %247 : vector<8x32xf32>
    %249 = arith.mulf %245, %219 : vector<8x32xf32>
    %250 = arith.mulf %244, %248 : vector<8x32xf32>
    %251 = arith.addf %249, %250 : vector<8x32xf32>
    %252 = math.tanh %251 : vector<8x32xf32>
    %253 = arith.mulf %246, %252 : vector<8x32xf32>
    %c1_i32_75 = arith.constant 1 : i32
    %254 = arith.truncf %253 : vector<8x32xf32> to vector<8x32xbf16>
    %cst_76 = arith.constant dense<0.000000e+00> : vector<8x160xf32>
    %255 = tpu.matmul %254, %1, %cst_76 {dimension_numbers = #tpu.dot_dimension_numbers<[1], [0], [0], [1], [0, 0, 1, 1], [], []>} : vector<8x32xbf16>, vector<32x160xbf16>, vector<8x160xf32> -> vector<8x160xf32>
    %c8_i32_77 = arith.constant 8 : i32
    %256 = arith.muli %c1_i32_75, %c8_i32_77 : i32
    %257 = tpu.assume_multiple %256, 8 : i32
    %258 = arith.index_cast %257 : i32 to index
    %c0_78 = arith.constant 0 : index
    %259 = vector.load %arg9[%258, %c0_78] : memref<64x128xf32, #tpu.memory_space<vmem>>, vector<8x128xf32>
    %260 = vector.extract_strided_slice %255 {offsets = [0, 0], sizes = [8, 128], strides = [1, 1]} : vector<8x160xf32> to vector<8x128xf32>
    %261 = arith.addf %259, %260 : vector<8x128xf32>
    %c0_i32_79 = arith.constant 0 : i32
    %262 = arith.cmpi sgt, %c1_i32_75, %c0_i32_79 : i32
    %263 = arith.extui %262 : i1 to i32
    %c0_i32_80 = arith.constant 0 : i32
    %264 = arith.cmpi ne, %263, %c0_i32_80 : i32
    scf.if %264 {
      %c1_i32_128 = arith.constant 1 : i32
      %444 = arith.subi %c1_i32_75, %c1_i32_128 : i32
      %445 = vector.extract_strided_slice %255 {offsets = [0, 128], sizes = [8, 32], strides = [1, 1]} : vector<8x160xf32> to vector<8x32xf32>
      %446 = vector.broadcast %3 : vector<1x32xf32> to vector<8x32xf32>
      %447 = arith.addf %445, %446 : vector<8x32xf32>
      %448 = arith.index_cast %444 : i32 to index
      %c0_129 = arith.constant 0 : index
      %c0_130 = arith.constant 0 : index
      %449 = vector.load %arg8[%448, %c0_129, %c0_130] : memref<8x8x32xf32, #tpu.memory_space<vmem>>, vector<1x8x32xf32>
      %450 = vector.shape_cast %449 : vector<1x8x32xf32> to vector<8x32xf32>
      %451 = vector.shape_cast %447 : vector<8x32xf32> to vector<1x8x32xf32>
      tpu.vector_store %arg8[%448, %c0_129, %c0_130], %451 {strides = array<i32>} : memref<8x8x32xf32, #tpu.memory_space<vmem>>, vector<1x8x32xf32>,
    } else {
    }
    %265 = arith.negf %261 : vector<8x128xf32>
    %266 = math.exp %265 : vector<8x128xf32>
    %cst_81 = arith.constant 1.000000e+00 : f32
    %267 = vector.broadcast %cst_81 : f32 to vector<8x128xf32>
    %268 = arith.addf %267, %266 : vector<8x128xf32>
    %269 = arith.divf %267, %268 : vector<8x128xf32>
    %270 = vector.extract_strided_slice %269 {offsets = [0, 0], sizes = [8, 32], strides = [1, 1]} : vector<8x128xf32> to vector<8x32xf32>
    %271 = vector.extract_strided_slice %269 {offsets = [0, 32], sizes = [8, 32], strides = [1, 1]} : vector<8x128xf32> to vector<8x32xf32>
    %272 = vector.extract_strided_slice %269 {offsets = [0, 96], sizes = [8, 32], strides = [1, 1]} : vector<8x128xf32> to vector<8x32xf32>
    %273 = vector.extract_strided_slice %261 {offsets = [0, 64], sizes = [8, 32], strides = [1, 1]} : vector<8x128xf32> to vector<8x32xf32>
    %274 = math.tanh %273 : vector<8x32xf32>
    %275 = arith.mulf %271, %251 : vector<8x32xf32>
    %276 = arith.mulf %270, %274 : vector<8x32xf32>
    %277 = arith.addf %275, %276 : vector<8x32xf32>
    %278 = math.tanh %277 : vector<8x32xf32>
    %279 = arith.mulf %272, %278 : vector<8x32xf32>
    %c2_i32_82 = arith.constant 2 : i32
    %280 = arith.truncf %279 : vector<8x32xf32> to vector<8x32xbf16>
    %cst_83 = arith.constant dense<0.000000e+00> : vector<8x160xf32>
    %281 = tpu.matmul %280, %1, %cst_83 {dimension_numbers = #tpu.dot_dimension_numbers<[1], [0], [0], [1], [0, 0, 1, 1], [], []>} : vector<8x32xbf16>, vector<32x160xbf16>, vector<8x160xf32> -> vector<8x160xf32>
    %c8_i32_84 = arith.constant 8 : i32
    %282 = arith.muli %c2_i32_82, %c8_i32_84 : i32
    %283 = tpu.assume_multiple %282, 8 : i32
    %284 = arith.index_cast %283 : i32 to index
    %c0_85 = arith.constant 0 : index
    %285 = vector.load %arg9[%284, %c0_85] : memref<64x128xf32, #tpu.memory_space<vmem>>, vector<8x128xf32>
    %286 = vector.extract_strided_slice %281 {offsets = [0, 0], sizes = [8, 128], strides = [1, 1]} : vector<8x160xf32> to vector<8x128xf32>
    %287 = arith.addf %285, %286 : vector<8x128xf32>
    %c0_i32_86 = arith.constant 0 : i32
    %288 = arith.cmpi sgt, %c2_i32_82, %c0_i32_86 : i32
    %289 = arith.extui %288 : i1 to i32
    %c0_i32_87 = arith.constant 0 : i32
    %290 = arith.cmpi ne, %289, %c0_i32_87 : i32
    scf.if %290 {
      %c1_i32_128 = arith.constant 1 : i32
      %444 = arith.subi %c2_i32_82, %c1_i32_128 : i32
      %445 = vector.extract_strided_slice %281 {offsets = [0, 128], sizes = [8, 32], strides = [1, 1]} : vector<8x160xf32> to vector<8x32xf32>
      %446 = vector.broadcast %3 : vector<1x32xf32> to vector<8x32xf32>
      %447 = arith.addf %445, %446 : vector<8x32xf32>
      %448 = arith.index_cast %444 : i32 to index
      %c0_129 = arith.constant 0 : index
      %c0_130 = arith.constant 0 : index
      %449 = vector.load %arg8[%448, %c0_129, %c0_130] : memref<8x8x32xf32, #tpu.memory_space<vmem>>, vector<1x8x32xf32>
      %450 = vector.shape_cast %449 : vector<1x8x32xf32> to vector<8x32xf32>
      %451 = vector.shape_cast %447 : vector<8x32xf32> to vector<1x8x32xf32>
      tpu.vector_store %arg8[%448, %c0_129, %c0_130], %451 {strides = array<i32>} : memref<8x8x32xf32, #tpu.memory_space<vmem>>, vector<1x8x32xf32>,
    } else {
    }
    %291 = arith.negf %287 : vector<8x128xf32>
    %292 = math.exp %291 : vector<8x128xf32>
    %cst_88 = arith.constant 1.000000e+00 : f32
    %293 = vector.broadcast %cst_88 : f32 to vector<8x128xf32>
    %294 = arith.addf %293, %292 : vector<8x128xf32>
    %295 = arith.divf %293, %294 : vector<8x128xf32>
    %296 = vector.extract_strided_slice %295 {offsets = [0, 0], sizes = [8, 32], strides = [1, 1]} : vector<8x128xf32> to vector<8x32xf32>
    %297 = vector.extract_strided_slice %295 {offsets = [0, 32], sizes = [8, 32], strides = [1, 1]} : vector<8x128xf32> to vector<8x32xf32>
    %298 = vector.extract_strided_slice %295 {offsets = [0, 96], sizes = [8, 32], strides = [1, 1]} : vector<8x128xf32> to vector<8x32xf32>
    %299 = vector.extract_strided_slice %287 {offsets = [0, 64], sizes = [8, 32], strides = [1, 1]} : vector<8x128xf32> to vector<8x32xf32>
    %300 = math.tanh %299 : vector<8x32xf32>
    %301 = arith.mulf %297, %277 : vector<8x32xf32>
    %302 = arith.mulf %296, %300 : vector<8x32xf32>
    %303 = arith.addf %301, %302 : vector<8x32xf32>
    %304 = math.tanh %303 : vector<8x32xf32>
    %305 = arith.mulf %298, %304 : vector<8x32xf32>
    %c3_i32_89 = arith.constant 3 : i32
    %306 = arith.truncf %305 : vector<8x32xf32> to vector<8x32xbf16>
    %cst_90 = arith.constant dense<0.000000e+00> : vector<8x160xf32>
    %307 = tpu.matmul %306, %1, %cst_90 {dimension_numbers = #tpu.dot_dimension_numbers<[1], [0], [0], [1], [0, 0, 1, 1], [], []>} : vector<8x32xbf16>, vector<32x160xbf16>, vector<8x160xf32> -> vector<8x160xf32>
    %c8_i32_91 = arith.constant 8 : i32
    %308 = arith.muli %c3_i32_89, %c8_i32_91 : i32
    %309 = tpu.assume_multiple %308, 8 : i32
    %310 = arith.index_cast %309 : i32 to index
    %c0_92 = arith.constant 0 : index
    %311 = vector.load %arg9[%310, %c0_92] : memref<64x128xf32, #tpu.memory_space<vmem>>, vector<8x128xf32>
    %312 = vector.extract_strided_slice %307 {offsets = [0, 0], sizes = [8, 128], strides = [1, 1]} : vector<8x160xf32> to vector<8x128xf32>
    %313 = arith.addf %311, %312 : vector<8x128xf32>
    %c0_i32_93 = arith.constant 0 : i32
    %314 = arith.cmpi sgt, %c3_i32_89, %c0_i32_93 : i32
    %315 = arith.extui %314 : i1 to i32
    %c0_i32_94 = arith.constant 0 : i32
    %316 = arith.cmpi ne, %315, %c0_i32_94 : i32
    scf.if %316 {
      %c1_i32_128 = arith.constant 1 : i32
      %444 = arith.subi %c3_i32_89, %c1_i32_128 : i32
      %445 = vector.extract_strided_slice %307 {offsets = [0, 128], sizes = [8, 32], strides = [1, 1]} : vector<8x160xf32> to vector<8x32xf32>
      %446 = vector.broadcast %3 : vector<1x32xf32> to vector<8x32xf32>
      %447 = arith.addf %445, %446 : vector<8x32xf32>
      %448 = arith.index_cast %444 : i32 to index
      %c0_129 = arith.constant 0 : index
      %c0_130 = arith.constant 0 : index
      %449 = vector.load %arg8[%448, %c0_129, %c0_130] : memref<8x8x32xf32, #tpu.memory_space<vmem>>, vector<1x8x32xf32>
      %450 = vector.shape_cast %449 : vector<1x8x32xf32> to vector<8x32xf32>
      %451 = vector.shape_cast %447 : vector<8x32xf32> to vector<1x8x32xf32>
      tpu.vector_store %arg8[%448, %c0_129, %c0_130], %451 {strides = array<i32>} : memref<8x8x32xf32, #tpu.memory_space<vmem>>, vector<1x8x32xf32>,
    } else {
    }
    %317 = arith.negf %313 : vector<8x128xf32>
    %318 = math.exp %317 : vector<8x128xf32>
    %cst_95 = arith.constant 1.000000e+00 : f32
    %319 = vector.broadcast %cst_95 : f32 to vector<8x128xf32>
    %320 = arith.addf %319, %318 : vector<8x128xf32>
    %321 = arith.divf %319, %320 : vector<8x128xf32>
    %322 = vector.extract_strided_slice %321 {offsets = [0, 0], sizes = [8, 32], strides = [1, 1]} : vector<8x128xf32> to vector<8x32xf32>
    %323 = vector.extract_strided_slice %321 {offsets = [0, 32], sizes = [8, 32], strides = [1, 1]} : vector<8x128xf32> to vector<8x32xf32>
    %324 = vector.extract_strided_slice %321 {offsets = [0, 96], sizes = [8, 32], strides = [1, 1]} : vector<8x128xf32> to vector<8x32xf32>
    %325 = vector.extract_strided_slice %313 {offsets = [0, 64], sizes = [8, 32], strides = [1, 1]} : vector<8x128xf32> to vector<8x32xf32>
    %326 = math.tanh %325 : vector<8x32xf32>
    %327 = arith.mulf %323, %303 : vector<8x32xf32>
    %328 = arith.mulf %322, %326 : vector<8x32xf32>
    %329 = arith.addf %327, %328 : vector<8x32xf32>
    %330 = math.tanh %329 : vector<8x32xf32>
    %331 = arith.mulf %324, %330 : vector<8x32xf32>
    %c4_i32_96 = arith.constant 4 : i32
    %332 = arith.truncf %331 : vector<8x32xf32> to vector<8x32xbf16>
    %cst_97 = arith.constant dense<0.000000e+00> : vector<8x160xf32>
    %333 = tpu.matmul %332, %1, %cst_97 {dimension_numbers = #tpu.dot_dimension_numbers<[1], [0], [0], [1], [0, 0, 1, 1], [], []>} : vector<8x32xbf16>, vector<32x160xbf16>, vector<8x160xf32> -> vector<8x160xf32>
    %c8_i32_98 = arith.constant 8 : i32
    %334 = arith.muli %c4_i32_96, %c8_i32_98 : i32
    %335 = tpu.assume_multiple %334, 8 : i32
    %336 = arith.index_cast %335 : i32 to index
    %c0_99 = arith.constant 0 : index
    %337 = vector.load %arg9[%336, %c0_99] : memref<64x128xf32, #tpu.memory_space<vmem>>, vector<8x128xf32>
    %338 = vector.extract_strided_slice %333 {offsets = [0, 0], sizes = [8, 128], strides = [1, 1]} : vector<8x160xf32> to vector<8x128xf32>
    %339 = arith.addf %337, %338 : vector<8x128xf32>
    %c0_i32_100 = arith.constant 0 : i32
    %340 = arith.cmpi sgt, %c4_i32_96, %c0_i32_100 : i32
    %341 = arith.extui %340 : i1 to i32
    %c0_i32_101 = arith.constant 0 : i32
    %342 = arith.cmpi ne, %341, %c0_i32_101 : i32
    scf.if %342 {
      %c1_i32_128 = arith.constant 1 : i32
      %444 = arith.subi %c4_i32_96, %c1_i32_128 : i32
      %445 = vector.extract_strided_slice %333 {offsets = [0, 128], sizes = [8, 32], strides = [1, 1]} : vector<8x160xf32> to vector<8x32xf32>
      %446 = vector.broadcast %3 : vector<1x32xf32> to vector<8x32xf32>
      %447 = arith.addf %445, %446 : vector<8x32xf32>
      %448 = arith.index_cast %444 : i32 to index
      %c0_129 = arith.constant 0 : index
      %c0_130 = arith.constant 0 : index
      %449 = vector.load %arg8[%448, %c0_129, %c0_130] : memref<8x8x32xf32, #tpu.memory_space<vmem>>, vector<1x8x32xf32>
      %450 = vector.shape_cast %449 : vector<1x8x32xf32> to vector<8x32xf32>
      %451 = vector.shape_cast %447 : vector<8x32xf32> to vector<1x8x32xf32>
      tpu.vector_store %arg8[%448, %c0_129, %c0_130], %451 {strides = array<i32>} : memref<8x8x32xf32, #tpu.memory_space<vmem>>, vector<1x8x32xf32>,
    } else {
    }
    %343 = arith.negf %339 : vector<8x128xf32>
    %344 = math.exp %343 : vector<8x128xf32>
    %cst_102 = arith.constant 1.000000e+00 : f32
    %345 = vector.broadcast %cst_102 : f32 to vector<8x128xf32>
    %346 = arith.addf %345, %344 : vector<8x128xf32>
    %347 = arith.divf %345, %346 : vector<8x128xf32>
    %348 = vector.extract_strided_slice %347 {offsets = [0, 0], sizes = [8, 32], strides = [1, 1]} : vector<8x128xf32> to vector<8x32xf32>
    %349 = vector.extract_strided_slice %347 {offsets = [0, 32], sizes = [8, 32], strides = [1, 1]} : vector<8x128xf32> to vector<8x32xf32>
    %350 = vector.extract_strided_slice %347 {offsets = [0, 96], sizes = [8, 32], strides = [1, 1]} : vector<8x128xf32> to vector<8x32xf32>
    %351 = vector.extract_strided_slice %339 {offsets = [0, 64], sizes = [8, 32], strides = [1, 1]} : vector<8x128xf32> to vector<8x32xf32>
    %352 = math.tanh %351 : vector<8x32xf32>
    %353 = arith.mulf %349, %329 : vector<8x32xf32>
    %354 = arith.mulf %348, %352 : vector<8x32xf32>
    %355 = arith.addf %353, %354 : vector<8x32xf32>
    %356 = math.tanh %355 : vector<8x32xf32>
    %357 = arith.mulf %350, %356 : vector<8x32xf32>
    %c5_i32_103 = arith.constant 5 : i32
    %358 = arith.truncf %357 : vector<8x32xf32> to vector<8x32xbf16>
    %cst_104 = arith.constant dense<0.000000e+00> : vector<8x160xf32>
    %359 = tpu.matmul %358, %1, %cst_104 {dimension_numbers = #tpu.dot_dimension_numbers<[1], [0], [0], [1], [0, 0, 1, 1], [], []>} : vector<8x32xbf16>, vector<32x160xbf16>, vector<8x160xf32> -> vector<8x160xf32>
    %c8_i32_105 = arith.constant 8 : i32
    %360 = arith.muli %c5_i32_103, %c8_i32_105 : i32
    %361 = tpu.assume_multiple %360, 8 : i32
    %362 = arith.index_cast %361 : i32 to index
    %c0_106 = arith.constant 0 : index
    %363 = vector.load %arg9[%362, %c0_106] : memref<64x128xf32, #tpu.memory_space<vmem>>, vector<8x128xf32>
    %364 = vector.extract_strided_slice %359 {offsets = [0, 0], sizes = [8, 128], strides = [1, 1]} : vector<8x160xf32> to vector<8x128xf32>
    %365 = arith.addf %363, %364 : vector<8x128xf32>
    %c0_i32_107 = arith.constant 0 : i32
    %366 = arith.cmpi sgt, %c5_i32_103, %c0_i32_107 : i32
    %367 = arith.extui %366 : i1 to i32
    %c0_i32_108 = arith.constant 0 : i32
    %368 = arith.cmpi ne, %367, %c0_i32_108 : i32
    scf.if %368 {
      %c1_i32_128 = arith.constant 1 : i32
      %444 = arith.subi %c5_i32_103, %c1_i32_128 : i32
      %445 = vector.extract_strided_slice %359 {offsets = [0, 128], sizes = [8, 32], strides = [1, 1]} : vector<8x160xf32> to vector<8x32xf32>
      %446 = vector.broadcast %3 : vector<1x32xf32> to vector<8x32xf32>
      %447 = arith.addf %445, %446 : vector<8x32xf32>
      %448 = arith.index_cast %444 : i32 to index
      %c0_129 = arith.constant 0 : index
      %c0_130 = arith.constant 0 : index
      %449 = vector.load %arg8[%448, %c0_129, %c0_130] : memref<8x8x32xf32, #tpu.memory_space<vmem>>, vector<1x8x32xf32>
      %450 = vector.shape_cast %449 : vector<1x8x32xf32> to vector<8x32xf32>
      %451 = vector.shape_cast %447 : vector<8x32xf32> to vector<1x8x32xf32>
      tpu.vector_store %arg8[%448, %c0_129, %c0_130], %451 {strides = array<i32>} : memref<8x8x32xf32, #tpu.memory_space<vmem>>, vector<1x8x32xf32>,
    } else {
    }
    %369 = arith.negf %365 : vector<8x128xf32>
    %370 = math.exp %369 : vector<8x128xf32>
    %cst_109 = arith.constant 1.000000e+00 : f32
    %371 = vector.broadcast %cst_109 : f32 to vector<8x128xf32>
    %372 = arith.addf %371, %370 : vector<8x128xf32>
    %373 = arith.divf %371, %372 : vector<8x128xf32>
    %374 = vector.extract_strided_slice %373 {offsets = [0, 0], sizes = [8, 32], strides = [1, 1]} : vector<8x128xf32> to vector<8x32xf32>
    %375 = vector.extract_strided_slice %373 {offsets = [0, 32], sizes = [8, 32], strides = [1, 1]} : vector<8x128xf32> to vector<8x32xf32>
    %376 = vector.extract_strided_slice %373 {offsets = [0, 96], sizes = [8, 32], strides = [1, 1]} : vector<8x128xf32> to vector<8x32xf32>
    %377 = vector.extract_strided_slice %365 {offsets = [0, 64], sizes = [8, 32], strides = [1, 1]} : vector<8x128xf32> to vector<8x32xf32>
    %378 = math.tanh %377 : vector<8x32xf32>
    %379 = arith.mulf %375, %355 : vector<8x32xf32>
    %380 = arith.mulf %374, %378 : vector<8x32xf32>
    %381 = arith.addf %379, %380 : vector<8x32xf32>
    %382 = math.tanh %381 : vector<8x32xf32>
    %383 = arith.mulf %376, %382 : vector<8x32xf32>
    %c6_i32_110 = arith.constant 6 : i32
    %384 = arith.truncf %383 : vector<8x32xf32> to vector<8x32xbf16>
    %cst_111 = arith.constant dense<0.000000e+00> : vector<8x160xf32>
    %385 = tpu.matmul %384, %1, %cst_111 {dimension_numbers = #tpu.dot_dimension_numbers<[1], [0], [0], [1], [0, 0, 1, 1], [], []>} : vector<8x32xbf16>, vector<32x160xbf16>, vector<8x160xf32> -> vector<8x160xf32>
    %c8_i32_112 = arith.constant 8 : i32
    %386 = arith.muli %c6_i32_110, %c8_i32_112 : i32
    %387 = tpu.assume_multiple %386, 8 : i32
    %388 = arith.index_cast %387 : i32 to index
    %c0_113 = arith.constant 0 : index
    %389 = vector.load %arg9[%388, %c0_113] : memref<64x128xf32, #tpu.memory_space<vmem>>, vector<8x128xf32>
    %390 = vector.extract_strided_slice %385 {offsets = [0, 0], sizes = [8, 128], strides = [1, 1]} : vector<8x160xf32> to vector<8x128xf32>
    %391 = arith.addf %389, %390 : vector<8x128xf32>
    %c0_i32_114 = arith.constant 0 : i32
    %392 = arith.cmpi sgt, %c6_i32_110, %c0_i32_114 : i32
    %393 = arith.extui %392 : i1 to i32
    %c0_i32_115 = arith.constant 0 : i32
    %394 = arith.cmpi ne, %393, %c0_i32_115 : i32
    scf.if %394 {
      %c1_i32_128 = arith.constant 1 : i32
      %444 = arith.subi %c6_i32_110, %c1_i32_128 : i32
      %445 = vector.extract_strided_slice %385 {offsets = [0, 128], sizes = [8, 32], strides = [1, 1]} : vector<8x160xf32> to vector<8x32xf32>
      %446 = vector.broadcast %3 : vector<1x32xf32> to vector<8x32xf32>
      %447 = arith.addf %445, %446 : vector<8x32xf32>
      %448 = arith.index_cast %444 : i32 to index
      %c0_129 = arith.constant 0 : index
      %c0_130 = arith.constant 0 : index
      %449 = vector.load %arg8[%448, %c0_129, %c0_130] : memref<8x8x32xf32, #tpu.memory_space<vmem>>, vector<1x8x32xf32>
      %450 = vector.shape_cast %449 : vector<1x8x32xf32> to vector<8x32xf32>
      %451 = vector.shape_cast %447 : vector<8x32xf32> to vector<1x8x32xf32>
      tpu.vector_store %arg8[%448, %c0_129, %c0_130], %451 {strides = array<i32>} : memref<8x8x32xf32, #tpu.memory_space<vmem>>, vector<1x8x32xf32>,
    } else {
    }
    %395 = arith.negf %391 : vector<8x128xf32>
    %396 = math.exp %395 : vector<8x128xf32>
    %cst_116 = arith.constant 1.000000e+00 : f32
    %397 = vector.broadcast %cst_116 : f32 to vector<8x128xf32>
    %398 = arith.addf %397, %396 : vector<8x128xf32>
    %399 = arith.divf %397, %398 : vector<8x128xf32>
    %400 = vector.extract_strided_slice %399 {offsets = [0, 0], sizes = [8, 32], strides = [1, 1]} : vector<8x128xf32> to vector<8x32xf32>
    %401 = vector.extract_strided_slice %399 {offsets = [0, 32], sizes = [8, 32], strides = [1, 1]} : vector<8x128xf32> to vector<8x32xf32>
    %402 = vector.extract_strided_slice %399 {offsets = [0, 96], sizes = [8, 32], strides = [1, 1]} : vector<8x128xf32> to vector<8x32xf32>
    %403 = vector.extract_strided_slice %391 {offsets = [0, 64], sizes = [8, 32], strides = [1, 1]} : vector<8x128xf32> to vector<8x32xf32>
    %404 = math.tanh %403 : vector<8x32xf32>
    %405 = arith.mulf %401, %381 : vector<8x32xf32>
    %406 = arith.mulf %400, %404 : vector<8x32xf32>
    %407 = arith.addf %405, %406 : vector<8x32xf32>
    %408 = math.tanh %407 : vector<8x32xf32>
    %409 = arith.mulf %402, %408 : vector<8x32xf32>
    %c7_i32_117 = arith.constant 7 : i32
    %410 = arith.truncf %409 : vector<8x32xf32> to vector<8x32xbf16>
    %cst_118 = arith.constant dense<0.000000e+00> : vector<8x160xf32>
    %411 = tpu.matmul %410, %1, %cst_118 {dimension_numbers = #tpu.dot_dimension_numbers<[1], [0], [0], [1], [0, 0, 1, 1], [], []>} : vector<8x32xbf16>, vector<32x160xbf16>, vector<8x160xf32> -> vector<8x160xf32>
    %c8_i32_119 = arith.constant 8 : i32
    %412 = arith.muli %c7_i32_117, %c8_i32_119 : i32
    %413 = tpu.assume_multiple %412, 8 : i32
    %414 = arith.index_cast %413 : i32 to index
    %c0_120 = arith.constant 0 : index
    %415 = vector.load %arg9[%414, %c0_120] : memref<64x128xf32, #tpu.memory_space<vmem>>, vector<8x128xf32>
    %416 = vector.extract_strided_slice %411 {offsets = [0, 0], sizes = [8, 128], strides = [1, 1]} : vector<8x160xf32> to vector<8x128xf32>
    %417 = arith.addf %415, %416 : vector<8x128xf32>
    %c0_i32_121 = arith.constant 0 : i32
    %418 = arith.cmpi sgt, %c7_i32_117, %c0_i32_121 : i32
    %419 = arith.extui %418 : i1 to i32
    %c0_i32_122 = arith.constant 0 : i32
    %420 = arith.cmpi ne, %419, %c0_i32_122 : i32
    scf.if %420 {
      %c1_i32_128 = arith.constant 1 : i32
      %444 = arith.subi %c7_i32_117, %c1_i32_128 : i32
      %445 = vector.extract_strided_slice %411 {offsets = [0, 128], sizes = [8, 32], strides = [1, 1]} : vector<8x160xf32> to vector<8x32xf32>
      %446 = vector.broadcast %3 : vector<1x32xf32> to vector<8x32xf32>
      %447 = arith.addf %445, %446 : vector<8x32xf32>
      %448 = arith.index_cast %444 : i32 to index
      %c0_129 = arith.constant 0 : index
      %c0_130 = arith.constant 0 : index
      %449 = vector.load %arg8[%448, %c0_129, %c0_130] : memref<8x8x32xf32, #tpu.memory_space<vmem>>, vector<1x8x32xf32>
      %450 = vector.shape_cast %449 : vector<1x8x32xf32> to vector<8x32xf32>
      %451 = vector.shape_cast %447 : vector<8x32xf32> to vector<1x8x32xf32>
      tpu.vector_store %arg8[%448, %c0_129, %c0_130], %451 {strides = array<i32>} : memref<8x8x32xf32, #tpu.memory_space<vmem>>, vector<1x8x32xf32>,
    } else {
    }
    %421 = arith.negf %417 : vector<8x128xf32>
    %422 = math.exp %421 : vector<8x128xf32>
    %cst_123 = arith.constant 1.000000e+00 : f32
    %423 = vector.broadcast %cst_123 : f32 to vector<8x128xf32>
    %424 = arith.addf %423, %422 : vector<8x128xf32>
    %425 = arith.divf %423, %424 : vector<8x128xf32>
    %426 = vector.extract_strided_slice %425 {offsets = [0, 0], sizes = [8, 32], strides = [1, 1]} : vector<8x128xf32> to vector<8x32xf32>
    %427 = vector.extract_strided_slice %425 {offsets = [0, 32], sizes = [8, 32], strides = [1, 1]} : vector<8x128xf32> to vector<8x32xf32>
    %428 = vector.extract_strided_slice %425 {offsets = [0, 96], sizes = [8, 32], strides = [1, 1]} : vector<8x128xf32> to vector<8x32xf32>
    %429 = vector.extract_strided_slice %417 {offsets = [0, 64], sizes = [8, 32], strides = [1, 1]} : vector<8x128xf32> to vector<8x32xf32>
    %430 = math.tanh %429 : vector<8x32xf32>
    %431 = arith.mulf %427, %407 : vector<8x32xf32>
    %432 = arith.mulf %426, %430 : vector<8x32xf32>
    %433 = arith.addf %431, %432 : vector<8x32xf32>
    %434 = math.tanh %433 : vector<8x32xf32>
    %435 = arith.mulf %428, %434 : vector<8x32xf32>
    %c8_i32_124 = arith.constant 8 : i32
    %436 = arith.truncf %435 : vector<8x32xf32> to vector<8x32xbf16>
    %437 = vector.extract_strided_slice %1 {offsets = [0, 128], sizes = [32, 32], strides = [1, 1]} : vector<32x160xbf16> to vector<32x32xbf16>
    %cst_125 = arith.constant dense<0.000000e+00> : vector<8x32xf32>
    %438 = tpu.matmul %436, %437, %cst_125 {dimension_numbers = #tpu.dot_dimension_numbers<[1], [0], [0], [1], [0, 0, 1, 1], [], []>} : vector<8x32xbf16>, vector<32x32xbf16>, vector<8x32xf32> -> vector<8x32xf32>
    %439 = vector.broadcast %3 : vector<1x32xf32> to vector<8x32xf32>
    %440 = arith.addf %438, %439 : vector<8x32xf32>
    %c7 = arith.constant 7 : index
    %c0_126 = arith.constant 0 : index
    %c0_127 = arith.constant 0 : index
    %441 = vector.load %arg8[%c7, %c0_126, %c0_127] : memref<8x8x32xf32, #tpu.memory_space<vmem>>, vector<1x8x32xf32>
    %442 = vector.shape_cast %441 : vector<1x8x32xf32> to vector<8x32xf32>
    %443 = vector.shape_cast %440 : vector<8x32xf32> to vector<1x8x32xf32>
    tpu.vector_store %arg8[%c7, %c0_126, %c0_127], %443 {strides = array<i32>} : memref<8x8x32xf32, #tpu.memory_space<vmem>>, vector<1x8x32xf32>,
    return
  }
  func.func @transform_0(%arg0: i32) -> (i32, i32, i32) {
    %c0_i32 = arith.constant 0 : i32
    %c0_i32_0 = arith.constant 0 : i32
    %c0_i32_1 = arith.constant 0 : i32
    return %c0_i32, %arg0, %c0_i32_0 : i32, i32, i32
  }
  func.func @transform_1(%arg0: i32) -> (i32, i32) {
    %c0_i32 = arith.constant 0 : i32
    %c0_i32_0 = arith.constant 0 : i32
    %c0_i32_1 = arith.constant 0 : i32
    return %c0_i32, %c0_i32_0 : i32, i32
  }
  func.func @transform_2(%arg0: i32) -> (i32, i32) {
    %c0_i32 = arith.constant 0 : i32
    %c0_i32_0 = arith.constant 0 : i32
    %c0_i32_1 = arith.constant 0 : i32
    return %c0_i32, %c0_i32_0 : i32, i32
  }
  func.func @transform_3(%arg0: i32) -> (i32, i32) {
    %c0_i32 = arith.constant 0 : i32
    %c0_i32_0 = arith.constant 0 : i32
    %c0_i32_1 = arith.constant 0 : i32
    return %c0_i32, %c0_i32_0 : i32, i32
  }
  func.func @transform_4(%arg0: i32) -> (i32, i32) {
    %c0_i32 = arith.constant 0 : i32
    %c0_i32_0 = arith.constant 0 : i32
    %c0_i32_1 = arith.constant 0 : i32
    return %c0_i32, %c0_i32_0 : i32, i32
  }
  func.func @transform_5(%arg0: i32) -> (i32, i32) {
    %c0_i32 = arith.constant 0 : i32
    %c0_i32_0 = arith.constant 0 : i32
    %c0_i32_1 = arith.constant 0 : i32
    return %c0_i32, %c0_i32_0 : i32, i32
  }
  func.func @transform_6(%arg0: i32) -> (i32, i32) {
    %c0_i32 = arith.constant 0 : i32
    %c0_i32_0 = arith.constant 0 : i32
    %c0_i32_1 = arith.constant 0 : i32
    return %c0_i32, %c0_i32_0 : i32, i32
  }
  func.func @transform_7(%arg0: i32) -> (i32, i32, i32) {
    %c0_i32 = arith.constant 0 : i32
    %c0_i32_0 = arith.constant 0 : i32
    %c0_i32_1 = arith.constant 0 : i32
    return %c0_i32, %arg0, %c0_i32_0 : i32, i32, i32
  }
}

</mosaic_0001>

<bundles_post_ra>
// kernel: tpu_custom_call.1
= control target key start
LH: loop header
LB: loop body
LE: loop exit
PB: predicated region body
PF: predicated region fallthrough
CT: control target
= control target key end

     0   :  { %12 = vsyncpa [#allocation4], 0  ;;  %s2531_s0 = inlined_call_operand.hbm [shape: bf16[8,8,16], index: 0, kind: input, shape index: {}]   ;;  %s2532_s1 = inlined_call_operand.hbm [shape: bf16[16,128], index: 1, kind: input, shape index: {}]   ;;  %s2533_s2 = inlined_call_operand.hbm [shape: bf16[32,256], index: 2, kind: input, shape index: {}]   ;;  %s2534_s3 = inlined_call_operand.hbm [shape: f32[1,128], index: 3, kind: input, shape index: {}]   ;;  %s2535_s4 = inlined_call_operand.hbm [shape: f32[1,128], index: 4, kind: input, shape index: {}]   ;;  %s2536_s5 = inlined_call_operand.hbm [shape: bf16[32,160], index: 5, kind: input, shape index: {}]   ;;  %s2537_s6 = inlined_call_operand.hbm [shape: f32[1,32], index: 6, kind: input, shape index: {}]   ;;  %s2538_s7 = inlined_call_operand.hbm [shape: f32[8,8,32], index: 7, kind: output, shape index: {}]  }
   0x1   :  { %13 = vsyncpa [#allocation7], 0 }
   0x2   :  { %14 = vsyncpa [#allocation10], 0 }
   0x3   :  { %15 = vsyncpa [#allocation13], 0 }
   0x4   :  { %16 = vsyncpa [#allocation5], 0  ;;  %s2075_s24 = smov [#allocation6]   ;;  %s2076_s26 = smov [#allocation9]  }
   0x5   :  { %s34_s25 = sshll.u32 %s2075_s24, 4  ;;  %s59_s27 = sshll.u32 %s2076_s26, 4  ;;  %s35_s25 = int_to_ptr.vmem [resolvable:$true] %s34_s25  ;;  %s2131_s27 = int_to_ptr.vmem [resolvable:$true] %s59_s27 }
   0x6   :  { %s1889_s30 = scalar_lea.hbm %s2532_s1, 128 }
   0x7   :  { %p1890_p0 = scmp.ne.s32.totalorder %s2532_s1, %s1889_s30  ;;  %p1893_p1 = scmp.lt.u32.totalorder %s1889_s30, %s2532_s1 }
   0x9   :  { %p1895_p2 = pnand %p1893_p1, %p1890_p0 }
   0xb   :  { %1898 = shalt.err (!%p1895_p2)
}
   0xc   :  { %s1899_s12 = scalar_lea.vmem %s35_s25, 128  ;;  %p1904_p4 = scmp.lt.s32.totalorder %s35_s25, %s35_s25 }
   0xd   :  { %p1900_p3 = scmp.ne.s32.totalorder %s35_s25, %s1899_s12  ;;  %p1905_p5 = scmp.lt.s32.totalorder %s1899_s12, %s1899_s12 }
   0xf   :  { %p1906_p6 = por %p1905_p5, %p1904_p4 }
  0x11   :  { %p1907_p7 = pnand %p1906_p6, %p1900_p3 }
  0x13   :  { %1910 = shalt.err (!%p1907_p7)
}
  0x14   :  { %s2077_s13 = smov 64   ;;  %s2078_s14 = smov 4  }
  0x15   :  { %40 = dma.hbm_to_vmem [thread:$0]  %s2532_s1, 128, %s35_s25, [#allocation7], %s2077_s13, %s2077_s13, %s2078_s14  }
  0x16   :  { %s1911_s19 = scalar_lea.hbm %s2534_s3, 16 }
  0x17   :  { %p1912_p8 = scmp.ne.s32.totalorder %s2534_s3, %s1911_s19  ;;  %p1915_p9 = scmp.lt.u32.totalorder %s1911_s19, %s2534_s3 }
  0x19   :  { %p1917_p10 = pnand %p1915_p9, %p1912_p8 }
  0x1b   :  { %1920 = shalt.err (!%p1917_p10)
}
  0x1c   :  { %s1921_s24 = scalar_lea.vmem %s2131_s27, 16  ;;  %s1925_s1 = scalar_lea.vmem %s2131_s27, 32 }
  0x1d   :  { %p1922_p11 = scmp.ne.s32.totalorder %s2131_s27, %s1921_s24  ;;  %p1926_p12 = scmp.lt.s32.totalorder %s2131_s27, %s2131_s27 }
  0x1e   :  { %p1927_p13 = scmp.lt.s32.totalorder %s1925_s1, %s1921_s24 }
  0x20   :  { %p1928_p0 = por %p1927_p13, %p1926_p12 }
  0x22   :  { %p1929_p1 = pnand %p1928_p0, %p1922_p11 }
  0x24   :  { %1932 = shalt.err (!%p1929_p1)
}
  0x25   :  { %62 = dma.hbm_to_vmem [thread:$0]  %s2534_s3, 16, %s2131_s27, [#allocation10]  }
  0x26   :  { %s2079_s28 = smov [#allocation12]   ;;  %s2080_s30 = smov [#allocation3]  }
  0x27   :  { %s78_s29 = sshll.u32 %s2079_s28, 4  ;;  %s22_s8 = sshll.u32 %s2080_s30, 4  ;;  %s79_s29 = int_to_ptr.vmem [resolvable:$true] %s78_s29  ;;  %s2166_s8 = int_to_ptr.vmem [resolvable:$true] %s22_s8 }
  0x28   :  { %s1933_s11 = scalar_lea.hbm %s2536_s5, 512 }
  0x29   :  { %p1934_p2 = scmp.ne.s32.totalorder %s2536_s5, %s1933_s11  ;;  %p1937_p3 = scmp.lt.u32.totalorder %s1933_s11, %s2536_s5 }
  0x2b   :  { %p1939_p4 = pnand %p1937_p3, %p1934_p2 }
  0x2d   :  { %1942 = shalt.err (!%p1939_p4)
}
  0x2e   :  { %s1943_s3 = scalar_lea.vmem %s79_s29, 512  ;;  %p1948_p6 = scmp.lt.s32.totalorder %s79_s29, %s79_s29 }
  0x2f   :  { %p1944_p5 = scmp.ne.s32.totalorder %s79_s29, %s1943_s3  ;;  %p1949_p7 = scmp.lt.s32.totalorder %s1943_s3, %s1943_s3 }
  0x31   :  { %p1950_p8 = por %p1949_p7, %p1948_p6 }
  0x33   :  { %p1951_p9 = pnand %p1950_p8, %p1944_p5 }
  0x35   :  { %1954 = shalt.err (!%p1951_p9)
}
  0x36   :  { %s2081_s27 = smov 128   ;;  %s2082_s18 = smov 8  }
  0x37   :  { %84 = dma.hbm_to_vmem [thread:$0]  %s2536_s5, 512, %s79_s29, [#allocation13], %s2081_s27, %s2081_s27, %s2082_s18  }
  0x38   :  { %s1955_s23 = scalar_lea.hbm %s2531_s0, 512 }
  0x39   :  { %p1956_p10 = scmp.ne.s32.totalorder %s2531_s0, %s1955_s23  ;;  %p1959_p11 = scmp.lt.u32.totalorder %s1955_s23, %s2531_s0 }
  0x3b   :  { %p1961_p12 = pnand %p1959_p11, %p1956_p10 }
  0x3d   :  { %1964 = shalt.err (!%p1961_p12)
}
  0x3e   :  { %s1965_s28 = scalar_lea.vmem %s2166_s8, 512  ;;  %p1970_p0 = scmp.lt.s32.totalorder %s2166_s8, %s2166_s8 }
  0x3f   :  { %p1966_p13 = scmp.ne.s32.totalorder %s2166_s8, %s1965_s28  ;;  %p1971_p1 = scmp.lt.s32.totalorder %s1965_s28, %s1965_s28 }
  0x41   :  { %p1972_p2 = por %p1971_p1, %p1970_p0 }
  0x43   :  { %p1973_p3 = pnand %p1972_p2, %p1966_p13 }
  0x45   :  { %1976 = shalt.err (!%p1973_p3)
}
  0x46   :  { %28 = dma.hbm_to_vmem [thread:$0]  %s2531_s0, 512, %s2166_s8, [#allocation4], %s2077_s13, %s2077_s13, %s2078_s14  }
  0x47   :  { %s2083_s30 = smov [#allocation8]   ;;  %s2084_s10 = smov [#allocation11]  }
  0x48   :  { %s46_s9 = sshll.u32 %s2083_s30, 4  ;;  %s69_s11 = sshll.u32 %s2084_s10, 4  ;;  %s47_s9 = int_to_ptr.vmem [resolvable:$true] %s46_s9  ;;  %s70_s11 = int_to_ptr.vmem [resolvable:$true] %s69_s11 }
  0x49   :  { %s1977_s16 = scalar_lea.hbm %s2533_s2, 512 }
  0x4a   :  { %p1978_p4 = scmp.ne.s32.totalorder %s2533_s2, %s1977_s16  ;;  %p1981_p5 = scmp.lt.u32.totalorder %s1977_s16, %s2533_s2 }
  0x4c   :  { %p1983_p6 = pnand %p1981_p5, %p1978_p4 }
  0x4e   :  { %1986 = shalt.err (!%p1983_p6)
}
  0x4f   :  { %s1987_s0 = scalar_lea.vmem %s47_s9, 512  ;;  %p1992_p8 = scmp.lt.s32.totalorder %s47_s9, %s47_s9 }
  0x50   :  { %p1988_p7 = scmp.ne.s32.totalorder %s47_s9, %s1987_s0  ;;  %p1993_p9 = scmp.lt.s32.totalorder %s1987_s0, %s1987_s0 }
  0x52   :  { %p1994_p10 = por %p1993_p9, %p1992_p8 }
  0x54   :  { %p1995_p11 = pnand %p1994_p10, %p1988_p7 }
  0x56   :  { %1998 = shalt.err (!%p1995_p11)
}
  0x57   :  { %52 = dma.hbm_to_vmem [thread:$0]  %s2533_s2, 512, %s47_s9, [#allocation7], %s2081_s27, %s2081_s27, %s2082_s18  }
  0x58   :  { %s1999_s23 = scalar_lea.hbm %s2535_s4, 16 }
  0x59   :  { %p2000_p12 = scmp.ne.s32.totalorder %s2535_s4, %s1999_s23  ;;  %p2003_p13 = scmp.lt.u32.totalorder %s1999_s23, %s2535_s4 }
  0x5b   :  { %p2005_p0 = pnand %p2003_p13, %p2000_p12 }
  0x5d   :  { %2008 = shalt.err (!%p2005_p0)
}
  0x5e   :  { %s2009_s28 = scalar_lea.vmem %s70_s11, 16  ;;  %s2013_s5 = scalar_lea.vmem %s70_s11, 32 }
  0x5f   :  { %p2010_p1 = scmp.ne.s32.totalorder %s70_s11, %s2009_s28  ;;  %p2014_p2 = scmp.lt.s32.totalorder %s70_s11, %s70_s11 }
  0x60   :  { %p2015_p3 = scmp.lt.s32.totalorder %s2013_s5, %s2009_s28 }
  0x62   :  { %p2016_p4 = por %p2015_p3, %p2014_p2 }
  0x64   :  { %p2017_p5 = pnand %p2016_p4, %p2010_p1 }
  0x66   :  { %2020 = shalt.err (!%p2017_p5)
}
  0x67   :  { %72 = dma.hbm_to_vmem [thread:$0]  %s2535_s4, 16, %s70_s11, [#allocation10]  }
  0x68   :  { %s2085_s30 = smov [#allocation14]   ;;  %s2021_s15 = scalar_lea.hbm %s2537_s6, 16 }
  0x69   :  { %s91_s9 = sshll.u32 %s2085_s30, 4  ;;  %p2022_p6 = scmp.ne.s32.totalorder %s2537_s6, %s2021_s15  ;;  %s92_s9 = int_to_ptr.vmem [resolvable:$true] %s91_s9 }
  0x6a   :  { %p2025_p7 = scmp.lt.u32.totalorder %s2021_s15, %s2537_s6 }
  0x6c   :  { %p2027_p8 = pnand %p2025_p7, %p2022_p6 }
  0x6e   :  { %2030 = shalt.err (!%p2027_p8)
}
  0x6f   :  { %s2031_s20 = scalar_lea.vmem %s92_s9, 16  ;;  %s2035_s4 = scalar_lea.vmem %s92_s9, 32 }
  0x70   :  { %p2032_p9 = scmp.ne.s32.totalorder %s92_s9, %s2031_s20  ;;  %p2036_p10 = scmp.lt.s32.totalorder %s92_s9, %s92_s9 }
  0x71   :  { %p2037_p11 = scmp.lt.s32.totalorder %s2035_s4, %s2031_s20 }
  0x73   :  { %p2038_p12 = por %p2037_p11, %p2036_p10 }
  0x75   :  { %p2039_p13 = pnand %p2038_p12, %p2032_p9 }
  0x77   :  { %2042 = shalt.err (!%p2039_p13)
}
  0x78   :  { %94 = dma.hbm_to_vmem [thread:$0]  %s2537_s6, 16, %s92_s9, [#allocation13]  }
  0x79   :  { %2065 = dma.done.wait [#allocation4], 512  }
  0x7a   :  { %2066 = vsyncadd [#allocation4], 4294966784 }
  0x7b   :  { %2067 = dma.done.wait [#allocation7], 640  }
  0x7c   :  { %2068 = vsyncadd [#allocation7], 4294966656 }
  0x7d   :  { %2069 = dma.done.wait [#allocation10], 32  }
  0x7e   :  { %2070 = vsyncadd [#allocation10], 4294967264 }
  0x7f   :  { %2071 = dma.done.wait [#allocation13], 528  }
  0x80   :  { %2072 = vsyncadd [#allocation13], 4294966768  ;;  %v2086_v0 = vmov 0   ;;  %v1744_v1 = vld [vmem:[#allocation6] sm:$0xff]   ;;  %v2243_v2 = vld [vmem:[#allocation8 + $0x4] ss:$8 sps:$4 sm:$0xff]  }
  0x81   :  { %312 = vmatprep.mubr.bf16.mxu1 %v2086_v0  ;;  %vm170_vm0 = vcmask 130048   ;;  %1702 = vmatprep.subr.bf16.mxu0 %v1744_v1  ;;  %v2245_v3 = vld [vmem:[#allocation8] ss:$8 sps:$4 sm:$0xff]   ;;  %v1748_v4 = vld [vmem:[#allocation3] sm:$0xff]   ;;  %s2087_s6 = smov 32   ;;  %vm276_vm1 = vcmask 261120  }
  0x82   :  { %280 = vmatprep.subr.bf16.mxu1 %v2243_v2  ;;  %1703 = vmatpush3.bf16.msra.mxu0 %v1744_v1  ;;  %v1749_v5 = vld [vmem:[#allocation3 + $0x8] sm:$0xff]   ;;  %v2251_v6 = vld [vmem:[#allocation8 + $0x14] ss:$8 sps:$4 sm:$0xff]   ;;  %v2253_v7 = vld [vmem:[#allocation8 + $0x10] ss:$8 sps:$4 sm:$0xff]   ;;  %vm2089_vm2 = vmmov 0  }
  0x83   :  { %281 = vmatpush1.bf16.msra.mxu1 %v2245_v3  ;;  %436 = vmatprep.subr.bf16.mxu0 %v2243_v2  ;;  %v2269_v8 = vld [vmem:[#allocation9] ss:$0 sm:$0xff]  ;;  %v1753_v50 = vld [vmem:[#allocation3 + $0x10] sm:$0xff]   ;;  %v1754_v51 = vld [vmem:[#allocation3 + $0x18] sm:$0xff]   ;;  %s2090_s14 = smov [#allocation15]  }
  0x84   :  { %1704 = vmatprep.mubr.msk.bf16.mxu0 %vm170_vm0, %v1748_v4  ;;  %282 = vmatprep.subr.bf16.mxu1 %v2251_v6  ;;  %s1623_s8 = sshll.u32 %s2090_s14, 4  ;;  %s1624_s8 = int_to_ptr.vmem [resolvable:$true] %s1623_s8 }
  0x85   :  { %1705 = vmatmul.mubr.msk.bf16.vlgmr.msra.gmra.mrb[0].mxu0 %vm170_vm0, %v1749_v5  ;;  %p2048_p1 = scmp.lt.s32.totalorder %s1624_s8, %s1624_s8 }
  0x86   :  { %437 = vmatpush1.bf16.msra.mxu0 %v2245_v3  ;;  %1708 = vmatprep.mubr.msk.bf16.mxu0 %vm170_vm0, %v1753_v50 }
  0x87   :  { %283 = vmatpush1.bf16.msra.mxu1 %v2253_v7  ;;  %438 = vmatprep.subr.bf16.mxu0 %v2251_v6 }
  0x88   :  { %353 = vmatprep.subr.bf16.mxu1 %v2243_v2 }
  0x8a   :  { %313 = vmatmul.mubr.bf16.vlgmr.msra.gmra.mrb[0].mxu1 %v2086_v0  ;;  %439 = vmatpush1.bf16.msra.mxu0 %v2253_v7 }
  0x8b   :  { %354 = vmatpush1.bf16.msra.mxu1 %v2245_v3  ;;  %385 = vmatprep.mubr.bf16.mxu1 %v2086_v0 }
  0x8c   :  { %355 = vmatprep.subr.bf16.mxu1 %v2251_v6  ;;  %590 = vmatprep.subr.bf16.mxu0 %v2243_v2 }
  0x8d   :  { %1709 = vmatmul.mubr.msk.bf16.gmra.mrb[4].mxu0 %vm170_vm0, %v1754_v51 }
  0x8e   :  { %468 = vmatprep.mubr.bf16.mxu0 %v2086_v0 }
  0x8f   :  { %356 = vmatpush1.bf16.msra.mxu1 %v2253_v7 }
  0x90   :  { %513 = vmatprep.subr.bf16.mxu1 %v2243_v2 }
 0x158   :  { %v2271_v9 = vpop.f32.mrb[0].mxu0 }
 0x159   :  { %v217_v10 = vpop.f32.mrb[1].mxu0  ;;  %v226_v61 = vadd.f32 %v2271_v9, %v2269_v8 }
 0x15a   :  { %v218_v11 = vadd.f32 %v2269_v8, %v217_v10  ;;  %v2274_v12 = vpop.f32.mrb[2].mxu0 }
 0x15b   :  { %v220_v13 = vpop.f32.mrb[3].mxu0 }
 0x15c   :  { %v221_v34 = vadd.f32 %v2269_v8, %v220_v13 }
 0x15d   :  { %v314_v14 = vpop.f32.mrb[0].mxu1 }
 0x15e   :  { %v321_v15 = vadd.f32 %v314_v14, %v218_v11  ;;  %v316_v16 = vpop.f32.mrb[1].mxu1 }
 0x15f   :  { %v317_v17 = vpop.f32.mrb[2].mxu1 }
 0x160   :  { %v318_v18 = vpop.f32.mrb[3].mxu1  ;;  %1761 = vtanh.f32 %v321_v15  ;;  %v1652_v20 = vmul.f32 -1.442695, %v321_v15  ;;  %v2296_v56 = vpop.f32.mrb[4].mxu0 }
 0x161   :  { %v2298_v57 = vpop.f32.mrb[5].mxu0 }
 0x162   :  { %1763 = vpow2.f32 %v1652_v20  ;;  %v2300_v58 = vpop.f32.mrb[6].mxu0 }
 0x163   :  { %v2302_v59 = vpop.f32.mrb[7].mxu0 }
 0x16a   :  { %v1762_v19 = vpop.eup %1761 }
 0x16b   :  { %331 = vrot.lane.b32.xlu0 %v1762_v19, %s2077_s13 }
 0x16c   :  { %v1764_v21 = vpop.eup %1763 }
 0x16d   :  { %v325_v22 = vadd.f32 1.0, %v1764_v21 }
 0x16f   :  { %1765 = vrcp.f32 %v325_v22 }
 0x179   :  { %v1766_v23 = vpop.eup %1765 }
 0x17a   :  { %v329_v26 = vmul.f32 0.0, %v1766_v23 }
 0x1dd   :  { %v332_v24 = vpop.permute.xlu0 %331 }
 0x1de   :  { %v334_v25 = vmul.f32 %v1766_v23, %v332_v24 }
 0x1e0   :  { %336 = vrot.lane.b32.xlu0 %v334_v25, %s2087_s6  ;;  %v229_v25 = vadd.f32 %v2274_v12, %v2269_v8 }
 0x252   :  { %v337_v27 = vpop.permute.xlu0 %336 }
 0x253   :  { %v339_v28 = vadd.f32 %v337_v27, %v329_v26 }
 0x255   :  { %1767 = vtanh.f32 %v339_v28 }
 0x25f   :  { %v1768_v29 = vpop.eup %1767 }
 0x260   :  { %342 = vrot.lane.b32.xlu1 %v1768_v29, %s2077_s13 }
 0x2d2   :  { %v343_v30 = vpop.permute.xlu1 %342 }
 0x2d3   :  { %v345_v31 = vmul.f32 %v1766_v23, %v343_v30 }
 0x2d5   :  { %v346_v32 = vpack.c.bf16 %v345_v31, %v345_v31 }
 0x2d7   :  { %348 = vrot.lane.b32.xlu1 %v346_v32, %s2087_s6 }
 0x349   :  { %v349_v33 = vpop.permute.xlu1 %348 }
 0x34a   :  { %1653 = vmatmul.mubr.msk.bf16.vlgmr.msra.gmra.mrb[4].mxu1 %vm276_vm1, %v349_v33 }
 0x34b   :  { %514 = vmatpush1.bf16.msra.mxu1 %v2245_v3  ;;  %545 = vmatprep.mubr.bf16.mxu1 %v2086_v0 }
 0x34c   :  { %515 = vmatprep.subr.bf16.mxu1 %v2251_v6 }
 0x34f   :  { %516 = vmatpush1.bf16.msra.mxu1 %v2253_v7 }
 0x350   :  { %667 = vmatprep.subr.bf16.mxu1 %v2243_v2 }
 0x41d   :  { %v387_v35 = vpop.f32.mrb[4].mxu1 }
 0x41e   :  { %v396_v36 = vadd.f32 %v387_v35, %v221_v34  ;;  %v2287_v37 = vpop.f32.mrb[5].mxu1 }
 0x41f   :  { %v391_v38 = vpop.f32.mrb[6].mxu1 }
 0x420   :  { %1769 = vtanh.f32 %v396_v36  ;;  %v392_v39 = vpop.f32.mrb[7].mxu1  ;;  %v1655_v41 = vmul.f32 -1.442695, %v396_v36 }
 0x422   :  { %1771 = vpow2.f32 %v1655_v41 }
 0x42a   :  { %v1770_v40 = vpop.eup %1769 }
 0x42b   :  { %414 = vrot.lane.b32.xlu0 %v1770_v40, %s2077_s13 }
 0x42c   :  { %v1772_v42 = vpop.eup %1771 }
 0x42d   :  { %v408_v43 = vadd.f32 1.0, %v1772_v42 }
 0x42f   :  { %1773 = vrcp.f32 %v408_v43 }
 0x439   :  { %v1774_v44 = vpop.eup %1773 }
 0x43a   :  { %v412_v47 = vmul.f32 %v1774_v44, %v339_v28 }
 0x49d   :  { %v415_v45 = vpop.permute.xlu0 %414 }
 0x49e   :  { %v417_v46 = vmul.f32 %v1774_v44, %v415_v45 }
 0x4a0   :  { %419 = vrot.lane.b32.xlu1 %v417_v46, %s2087_s6  ;;  %v234_v46 = vadd.f32 %v2269_v8, %v2298_v57 }
 0x512   :  { %v420_v48 = vpop.permute.xlu1 %419 }
 0x513   :  { %v422_v49 = vadd.f32 %v420_v48, %v412_v47 }
 0x515   :  { %1775 = vtanh.f32 %v422_v49 }
 0x51f   :  { %v1776_v52 = vpop.eup %1775 }
 0x520   :  { %425 = vrot.lane.b32.xlu0 %v1776_v52, %s2077_s13 }
 0x592   :  { %v426_v53 = vpop.permute.xlu0 %425 }
 0x593   :  { %v428_v54 = vmul.f32 %v1774_v44, %v426_v53 }
 0x595   :  { %v429_v55 = vpack.c.bf16 %v428_v54, %v428_v54 }
 0x597   :  { %431 = vrot.lane.b32.xlu1 %v429_v55, %s2087_s6 }
 0x609   :  { %v432_v60 = vpop.permute.xlu1 %431 }
 0x60a   :  { %1656 = vmatmul.mubr.msk.bf16.vlgmr.msra.gmra.mrb[8].mxu0 %vm276_vm1, %v432_v60 }
 0x60b   :  { %591 = vmatpush1.bf16.msra.mxu0 %v2245_v3  ;;  %622 = vmatprep.mubr.bf16.mxu0 %v2086_v0 }
 0x60c   :  { %592 = vmatprep.subr.bf16.mxu0 %v2251_v6 }
 0x60f   :  { %593 = vmatpush1.bf16.msra.mxu0 %v2253_v7 }
 0x610   :  { %744 = vmatprep.subr.bf16.mxu0 %v2243_v2 }
 0x6dd   :  { %v470_v62 = vpop.f32.mrb[8].mxu0 }
 0x6de   :  { %v479_v63 = vadd.f32 %v470_v62, %v226_v61  ;;  %v2312_v1 = vpop.f32.mrb[9].mxu0 }
 0x6df   :  { %v474_v4 = vpop.f32.mrb[10].mxu0 }
 0x6e0   :  { %1777 = vtanh.f32 %v479_v63  ;;  %v475_v5 = vpop.f32.mrb[11].mxu0  ;;  %v1657_v11 = vmul.f32 -1.442695, %v479_v63 }
 0x6e2   :  { %1779 = vpow2.f32 %v1657_v11 }
 0x6ea   :  { %v1778_v10 = vpop.eup %1777 }
 0x6eb   :  { %491 = vrot.lane.b32.xlu0 %v1778_v10, %s2077_s13 }
 0x6ec   :  { %v1780_v13 = vpop.eup %1779 }
 0x6ed   :  { %v485_v14 = vadd.f32 1.0, %v1780_v13 }
 0x6ef   :  { %1781 = vrcp.f32 %v485_v14 }
 0x6f9   :  { %v1782_v15 = vpop.eup %1781 }
 0x6fa   :  { %v489_v9 = vmul.f32 %v1782_v15, %v422_v49 }
 0x75d   :  { %v492_v16 = vpop.permute.xlu0 %491 }
 0x75e   :  { %v494_v17 = vmul.f32 %v1782_v15, %v492_v16 }
 0x760   :  { %496 = vrot.lane.b32.xlu1 %v494_v17, %s2087_s6 }
 0x7d2   :  { %v497_v18 = vpop.permute.xlu1 %496 }
 0x7d3   :  { %v499_v19 = vadd.f32 %v497_v18, %v489_v9 }
 0x7d5   :  { %1783 = vtanh.f32 %v499_v19 }
 0x7df   :  { %v1784_v20 = vpop.eup %1783 }
 0x7e0   :  { %502 = vrot.lane.b32.xlu0 %v1784_v20, %s2077_s13 }
 0x852   :  { %v503_v21 = vpop.permute.xlu0 %502 }
 0x853   :  { %v505_v22 = vmul.f32 %v1782_v15, %v503_v21  ;;  %v237_v15 = vadd.f32 %v2269_v8, %v2302_v59 }
 0x855   :  { %v506_v23 = vpack.c.bf16 %v505_v22, %v505_v22 }
 0x857   :  { %508 = vrot.lane.b32.xlu1 %v506_v23, %s2087_s6 }
 0x8c9   :  { %v509_v24 = vpop.permute.xlu1 %508 }
 0x8ca   :  { %1658 = vmatmul.mubr.msk.bf16.vlgmr.msra.gmra.mrb[8].mxu1 %vm276_vm1, %v509_v24 }
 0x8cb   :  { %668 = vmatpush1.bf16.msra.mxu1 %v2245_v3  ;;  %699 = vmatprep.mubr.bf16.mxu1 %v2086_v0 }
 0x8cc   :  { %669 = vmatprep.subr.bf16.mxu1 %v2251_v6 }
 0x8cf   :  { %670 = vmatpush1.bf16.msra.mxu1 %v2253_v7 }
 0x8d0   :  { %821 = vmatprep.subr.bf16.mxu1 %v2243_v2 }
 0x99d   :  { %v547_v26 = vpop.f32.mrb[8].mxu1 }
 0x99e   :  { %v556_v27 = vadd.f32 %v547_v26, %v229_v25  ;;  %v2326_v28 = vpop.f32.mrb[9].mxu1 }
 0x99f   :  { %v551_v29 = vpop.f32.mrb[10].mxu1 }
 0x9a0   :  { %1785 = vtanh.f32 %v556_v27  ;;  %v552_v30 = vpop.f32.mrb[11].mxu1  ;;  %v1659_v32 = vmul.f32 -1.442695, %v556_v27 }
 0x9a2   :  { %1787 = vpow2.f32 %v1659_v32 }
 0x9aa   :  { %v1786_v31 = vpop.eup %1785 }
 0x9ab   :  { %568 = vrot.lane.b32.xlu0 %v1786_v31, %s2077_s13 }
 0x9ac   :  { %v1788_v33 = vpop.eup %1787 }
 0x9ad   :  { %v562_v34 = vadd.f32 1.0, %v1788_v33  ;;  %v242_v33 = vadd.f32 %v2296_v56, %v2269_v8 }
 0x9af   :  { %1789 = vrcp.f32 %v562_v34 }
 0x9b9   :  { %v1790_v35 = vpop.eup %1789 }
 0x9ba   :  { %v566_v12 = vmul.f32 %v1790_v35, %v499_v19 }
 0xa1d   :  { %v569_v36 = vpop.permute.xlu0 %568 }
 0xa1e   :  { %v571_v38 = vmul.f32 %v1790_v35, %v569_v36 }
 0xa20   :  { %573 = vrot.lane.b32.xlu1 %v571_v38, %s2087_s6 }
 0xa92   :  { %v574_v39 = vpop.permute.xlu1 %573 }
 0xa93   :  { %v576_v40 = vadd.f32 %v574_v39, %v566_v12 }
 0xa95   :  { %1791 = vtanh.f32 %v576_v40 }
 0xa9f   :  { %v1792_v41 = vpop.eup %1791 }
 0xaa0   :  { %579 = vrot.lane.b32.xlu0 %v1792_v41, %s2077_s13 }
 0xb12   :  { %v580_v42 = vpop.permute.xlu0 %579 }
 0xb13   :  { %v582_v43 = vmul.f32 %v1790_v35, %v580_v42 }
 0xb15   :  { %v583_v44 = vpack.c.bf16 %v582_v43, %v582_v43 }
 0xb17   :  { %585 = vrot.lane.b32.xlu1 %v583_v44, %s2087_s6 }
 0xb89   :  { %v586_v45 = vpop.permute.xlu1 %585 }
 0xb8a   :  { %1660 = vmatmul.mubr.msk.bf16.vlgmr.msra.gmra.mrb[12].mxu0 %vm276_vm1, %v586_v45 }
 0xb8b   :  { %745 = vmatpush1.bf16.msra.mxu0 %v2245_v3  ;;  %776 = vmatprep.mubr.bf16.mxu0 %v2086_v0 }
 0xb8c   :  { %746 = vmatprep.subr.bf16.mxu0 %v2251_v6 }
 0xb8f   :  { %747 = vmatpush1.bf16.msra.mxu0 %v2253_v7 }
 0xc5d   :  { %v624_v47 = vpop.f32.mrb[12].mxu0 }
 0xc5e   :  { %v633_v48 = vadd.f32 %v624_v47, %v234_v46  ;;  %v2339_v49 = vpop.f32.mrb[13].mxu0 }
 0xc5f   :  { %v628_v50 = vpop.f32.mrb[14].mxu0 }
 0xc60   :  { %1793 = vtanh.f32 %v633_v48  ;;  %v629_v51 = vpop.f32.mrb[15].mxu0  ;;  %v1661_v53 = vmul.f32 -1.442695, %v633_v48 }
 0xc62   :  { %1795 = vpow2.f32 %v1661_v53 }
 0xc6a   :  { %v1794_v52 = vpop.eup %1793 }
 0xc6b   :  { %645 = vrot.lane.b32.xlu0 %v1794_v52, %s2077_s13 }
 0xc6c   :  { %v1796_v54 = vpop.eup %1795 }
 0xc6d   :  { %v639_v55 = vadd.f32 1.0, %v1796_v54  ;;  %v245_v54 = vadd.f32 %v2300_v58, %v2269_v8 }
 0xc6f   :  { %1797 = vrcp.f32 %v639_v55 }
 0xc79   :  { %v1798_v60 = vpop.eup %1797 }
 0xc7a   :  { %v643_v57 = vmul.f32 %v1798_v60, %v576_v40 }
 0xcdd   :  { %v646_v61 = vpop.permute.xlu0 %645 }
 0xcde   :  { %v648_v62 = vmul.f32 %v1798_v60, %v646_v61 }
 0xce0   :  { %650 = vrot.lane.b32.xlu1 %v648_v62, %s2087_s6 }
 0xd52   :  { %v651_v63 = vpop.permute.xlu1 %650 }
 0xd53   :  { %v653_v4 = vadd.f32 %v651_v63, %v643_v57 }
 0xd55   :  { %1799 = vtanh.f32 %v653_v4 }
 0xd5f   :  { %v1800_v5 = vpop.eup %1799 }
 0xd60   :  { %656 = vrot.lane.b32.xlu0 %v1800_v5, %s2077_s13 }
 0xdd2   :  { %v657_v10 = vpop.permute.xlu0 %656 }
 0xdd3   :  { %v659_v11 = vmul.f32 %v1798_v60, %v657_v10 }
 0xdd5   :  { %v660_v13 = vpack.c.bf16 %v659_v11, %v659_v11 }
 0xdd7   :  { %662 = vrot.lane.b32.xlu1 %v660_v13, %s2087_s6 }
 0xe49   :  { %v663_v14 = vpop.permute.xlu1 %662 }
 0xe4a   :  { %1662 = vmatmul.mubr.msk.bf16.vlgmr.msra.gmra.mrb[12].mxu1 %vm276_vm1, %v663_v14 }
 0xe4b   :  { %822 = vmatpush1.bf16.msra.mxu1 %v2245_v3  ;;  %853 = vmatprep.mubr.bf16.mxu1 %v2086_v0 }
 0xe4c   :  { %823 = vmatprep.subr.bf16.mxu1 %v2251_v6 }
 0xe4f   :  { %824 = vmatpush1.bf16.msra.mxu1 %v2253_v7 }
 0xf1d   :  { %v701_v16 = vpop.f32.mrb[12].mxu1 }
 0xf1e   :  { %v710_v17 = vadd.f32 %v701_v16, %v237_v15  ;;  %v2352_v9 = vpop.f32.mrb[13].mxu1  ;;  %v2375_v16 = vld [vmem:[#allocation12 + $0x4] ss:$8 sps:$4 sm:$0xff]  }
 0xf1f   :  { %v705_v18 = vpop.f32.mrb[14].mxu1  ;;  %959 = vmatprep.subr.bf16.mxu1 %v2375_v16 }
 0xf20   :  { %1801 = vtanh.f32 %v710_v17  ;;  %v706_v19 = vpop.f32.mrb[15].mxu1  ;;  %v1663_v3 = vmul.f32 -1.442695, %v710_v17  ;;  %v2377_v17 = vld [vmem:[#allocation12] ss:$8 sps:$4 sm:$0xff]   ;;  %v2088_v18 = vmov 0.0  }
 0xf21   :  { %1712 = vmatprep.subr.bf16.mxu0 %v2088_v18  ;;  %v2380_v19 = vld [vmem:[#allocation12 + $0x14] ss:$8 sps:$4 sm:$0xff]  }
 0xf22   :  { %1803 = vpow2.f32 %v1663_v3 }
 0xf2a   :  { %v1802_v20 = vpop.eup %1801 }
 0xf2b   :  { %722 = vrot.lane.b32.xlu0 %v1802_v20, %s2077_s13  ;;  %v2388_v20 = vld [vmem:[#allocation12 + $0x10] ss:$8 sps:$4 sm:$0xff]  }
 0xf2c   :  { %v1804_v21 = vpop.eup %1803 }
 0xf2d   :  { %v716_v22 = vadd.f32 1.0, %v1804_v21 }
 0xf2f   :  { %1805 = vrcp.f32 %v716_v22 }
 0xf39   :  { %v1806_v23 = vpop.eup %1805 }
 0xf3a   :  { %v720_v59 = vmul.f32 %v1806_v23, %v653_v4 }
 0xf9d   :  { %v723_v7 = vpop.permute.xlu0 %722 }
 0xf9e   :  { %v725_v24 = vmul.f32 %v1806_v23, %v723_v7 }
 0xfa0   :  { %727 = vrot.lane.b32.xlu1 %v725_v24, %s2087_s6 }
0x1012   :  { %v728_v25 = vpop.permute.xlu1 %727 }
0x1013   :  { %v730_v26 = vadd.f32 %v728_v25, %v720_v59 }
0x1015   :  { %1807 = vtanh.f32 %v730_v26 }
0x101f   :  { %v1808_v27 = vpop.eup %1807 }
0x1020   :  { %733 = vrot.lane.b32.xlu0 %v1808_v27, %s2077_s13 }
0x1092   :  { %v734_v29 = vpop.permute.xlu0 %733 }
0x1093   :  { %v736_v30 = vmul.f32 %v1806_v23, %v734_v29 }
0x1095   :  { %v737_v31 = vpack.c.bf16 %v736_v30, %v736_v30 }
0x1097   :  { %739 = vrot.lane.b32.xlu1 %v737_v31, %s2087_s6 }
0x1109   :  { %v740_v32 = vpop.permute.xlu1 %739 }
0x110a   :  { %1664 = vmatmul.mubr.msk.bf16.vlgmr.msra.gmra.mrb[16].mxu0 %vm276_vm1, %v740_v32 }
0x110b   :  { %1716 = vmatprep.mubr.msk.bf16.mxu0 %vm2089_vm2, %v2088_v18  ;;  %1713 = vmatpush3.bf16.msra.mxu0 %v2243_v2 }
0x110c   :  { %1714 = vmatprep.subr.bf16.mxu0 %v2088_v18 }
0x110f   :  { %1715 = vmatpush3.bf16.msra.mxu0 %v2251_v6  ;;  %v2409_v6 = vld [vmem:[#allocation11] ss:$0 sm:$0xff] }
0x1110   :  { %1032 = vmatprep.subr.bf16.mxu0 %v2375_v16  ;;  %v403_v7 = vadd.f32 %v2409_v6, %v2287_v37 }
0x11dd   :  { %v778_v34 = vpop.f32.mrb[16].mxu0 }
0x11de   :  { %v787_v35 = vadd.f32 %v778_v34, %v242_v33  ;;  %v2361_v36 = vpop.f32.mrb[17].mxu0 }
0x11df   :  { %v782_v38 = vpop.f32.mrb[18].mxu0 }
0x11e0   :  { %1809 = vtanh.f32 %v787_v35  ;;  %v783_v12 = vpop.f32.mrb[19].mxu0  ;;  %v1665_v40 = vmul.f32 -1.442695, %v787_v35 }
0x11e2   :  { %1811 = vpow2.f32 %v1665_v40 }
0x11ea   :  { %v1810_v39 = vpop.eup %1809 }
0x11eb   :  { %799 = vrot.lane.b32.xlu0 %v1810_v39, %s2077_s13 }
0x11ec   :  { %v1812_v41 = vpop.eup %1811 }
0x11ed   :  { %v793_v42 = vadd.f32 1.0, %v1812_v41 }
0x11ef   :  { %1813 = vrcp.f32 %v793_v42 }
0x11f9   :  { %v1814_v43 = vpop.eup %1813 }
0x11fa   :  { %v797_v56 = vmul.f32 %v1814_v43, %v730_v26 }
0x125d   :  { %v800_v44 = vpop.permute.xlu0 %799 }
0x125e   :  { %v802_v45 = vmul.f32 %v1814_v43, %v800_v44 }
0x1260   :  { %804 = vrot.lane.b32.xlu1 %v802_v45, %s2087_s6 }
0x12d2   :  { %v805_v46 = vpop.permute.xlu1 %804 }
0x12d3   :  { %v807_v47 = vadd.f32 %v805_v46, %v797_v56 }
0x12d5   :  { %1815 = vtanh.f32 %v807_v47 }
0x12df   :  { %v1816_v48 = vpop.eup %1815 }
0x12e0   :  { %810 = vrot.lane.b32.xlu0 %v1816_v48, %s2077_s13  ;;  %v2427_v48 = vld [vmem:[#allocation14] ss:$0 sm:$0xff] }
0x1352   :  { %v811_v50 = vpop.permute.xlu0 %810 }
0x1353   :  { %v813_v51 = vmul.f32 %v1814_v43, %v811_v50 }
0x1355   :  { %v814_v52 = vpack.c.bf16 %v813_v51, %v813_v51 }
0x1357   :  { %816 = vrot.lane.b32.xlu1 %v814_v52, %s2087_s6 }
0x13c9   :  { %v817_v53 = vpop.permute.xlu1 %816 }
0x13ca   :  { %1666 = vmatmul.mubr.msk.bf16.vlgmr.msra.gmra.mrb[16].mxu1 %vm276_vm1, %v817_v53 }
0x13cb   :  { %991 = vmatprep.mubr.bf16.mxu1 %v2086_v0  ;;  %960 = vmatpush1.bf16.msra.mxu1 %v2377_v17 }
0x13cc   :  { %961 = vmatprep.subr.bf16.mxu1 %v2380_v19 }
0x13cf   :  { %962 = vmatpush1.bf16.msra.mxu1 %v2388_v20 }
0x13d0   :  { %1114 = vmatprep.subr.bf16.mxu1 %v2375_v16 }
0x149d   :  { %v855_v55 = vpop.f32.mrb[16].mxu1 }
0x149e   :  { %v864_v60 = vadd.f32 %v855_v55, %v245_v54  ;;  %v2371_v61 = vpop.f32.mrb[17].mxu1 }
0x149f   :  { %v859_v62 = vpop.f32.mrb[18].mxu1 }
0x14a0   :  { %1817 = vtanh.f32 %v864_v60  ;;  %v860_v57 = vpop.f32.mrb[19].mxu1  ;;  %v1667_v4 = vmul.f32 -1.442695, %v864_v60 }
0x14a2   :  { %1819 = vpow2.f32 %v1667_v4 }
0x14aa   :  { %v1818_v63 = vpop.eup %1817 }
0x14ab   :  { %876 = vrot.lane.b32.xlu0 %v1818_v63, %s2077_s13 }
0x14ac   :  { %v1820_v5 = vpop.eup %1819 }
0x14ad   :  { %v870_v10 = vadd.f32 1.0, %v1820_v5 }
0x14af   :  { %1821 = vrcp.f32 %v870_v10 }
0x14b9   :  { %v1822_v11 = vpop.eup %1821 }
0x14ba   :  { %v874_v8 = vmul.f32 %v1822_v11, %v807_v47  ;;  %v480_v47 = vadd.f32 %v2409_v6, %v2312_v1 }
0x151d   :  { %v877_v13 = vpop.permute.xlu0 %876 }
0x151e   :  { %v879_v14 = vmul.f32 %v1822_v11, %v877_v13 }
0x1520   :  { %881 = vrot.lane.b32.xlu1 %v879_v14, %s2087_s6 }
0x1592   :  { %v882_v58 = vpop.permute.xlu1 %881 }
0x1593   :  { %v884_v15 = vadd.f32 %v882_v58, %v874_v8 }
0x1595   :  { %1823 = vtanh.f32 %v884_v15 }
0x159f   :  { %v1824_v3 = vpop.eup %1823 }
0x15a0   :  { %887 = vrot.lane.b32.xlu0 %v1824_v3, %s2077_s13 }
0x1612   :  { %v888_v2 = vpop.permute.xlu0 %887 }
0x1613   :  { %v890_v21 = vmul.f32 %v1822_v11, %v888_v2  ;;  %v557_v2 = vadd.f32 %v2409_v6, %v2326_v28 }
0x1615   :  { %v891_v22 = vpack.c.bf16 %v890_v21, %v890_v21 }
0x1617   :  { %893 = vrot.lane.b32.xlu1 %v891_v22, %s2087_s6 }
0x1689   :  { %v894_v23 = vpop.permute.xlu1 %893 }
0x168a   :  { %1717 = vmatmul.mubr.msk.bf16.vlgmr.msra.gmra.mrb[20].mxu0 %vm276_vm1, %v894_v23  ;;  %1673 = vmatmul.mubr.msk.bf16.vlgmr.msra.gmra.mrb[20].mxu1 %vm276_vm1, %v894_v23 }
0x168b   :  { %1033 = vmatpush1.bf16.msra.mxu0 %v2377_v17  ;;  %1064 = vmatprep.mubr.bf16.mxu0 %v2086_v0 }
0x168c   :  { %1034 = vmatprep.subr.bf16.mxu0 %v2380_v19  ;;  %1115 = vmatpush1.bf16.msra.mxu1 %v2377_v17 }
0x168d   :  { %1116 = vmatprep.subr.bf16.mxu1 %v2380_v19  ;;  %1146 = vmatprep.mubr.bf16.mxu1 %v2086_v0 }
0x168f   :  { %1035 = vmatpush1.bf16.msra.mxu0 %v2388_v20 }
0x1690   :  { %1117 = vmatpush1.bf16.msra.mxu1 %v2388_v20  ;;  %1191 = vmatprep.subr.bf16.mxu0 %v2375_v16 }
0x1691   :  { %1268 = vmatprep.subr.bf16.mxu1 %v2375_v16 }
0x175d   :  { %v2413_v24 = vpop.f32.mrb[20].mxu0  ;;  %v993_v59 = vpop.f32.mrb[20].mxu1 }
0x175e   :  { %v1000_v25 = vadd.f32 %v993_v59, %v403_v7  ;;  %v1718_v26 = vpop.f32.mrb[21].mxu0  ;;  %v995_v27 = vpop.f32.mrb[21].mxu1 }
0x175f   :  { %v935_v29 = vpop.f32.mrb[22].mxu0  ;;  %v996_v30 = vpop.f32.mrb[22].mxu1 }
0x1760   :  { %1825 = vtanh.f32 %v1000_v25  ;;  %v1719_v31 = vpop.f32.mrb[23].mxu0  ;;  %v997_v32 = vpop.f32.mrb[23].mxu1  ;;  %v1674_v34 = vmul.f32 -1.442695, %v1000_v25 }
0x1762   :  { %1827 = vpow2.f32 %v1674_v34 }
0x176a   :  { %v1826_v33 = vpop.eup %1825 }
0x176b   :  { %1010 = vrot.lane.b32.xlu0 %v1826_v33, %s2077_s13 }
0x176c   :  { %v1828_v35 = vpop.eup %1827 }
0x176d   :  { %v1004_v38 = vadd.f32 1.0, %v1828_v35 }
0x176f   :  { %1829 = vrcp.f32 %v1004_v38 }
0x1779   :  { %v1830_v37 = vpop.eup %1829 }
0x177a   :  { %v1008_v40 = vmul.f32 %v1830_v37, %v884_v15 }
0x17dd   :  { %v1011_v12 = vpop.permute.xlu0 %1010 }
0x17de   :  { %v1013_v39 = vmul.f32 %v1830_v37, %v1011_v12 }
0x17e0   :  { %1015 = vrot.lane.b32.xlu1 %v1013_v39, %s2087_s6 }
0x1852   :  { %v1016_v41 = vpop.permute.xlu1 %1015 }
0x1853   :  { %v1018_v42 = vadd.f32 %v1016_v41, %v1008_v40  ;;  %v634_v41 = vadd.f32 %v2409_v6, %v2339_v49 }
0x1855   :  { %1831 = vtanh.f32 %v1018_v42 }
0x185f   :  { %v1832_v43 = vpop.eup %1831 }
0x1860   :  { %1021 = vrot.lane.b32.xlu0 %v1832_v43, %s2077_s13 }
0x18d2   :  { %v1022_v44 = vpop.permute.xlu0 %1021 }
0x18d3   :  { %v1024_v45 = vmul.f32 %v1830_v37, %v1022_v44 }
0x18d5   :  { %v1025_v56 = vpack.c.bf16 %v1024_v45, %v1024_v45 }
0x18d7   :  { %1027 = vrot.lane.b32.xlu1 %v1025_v56, %s2087_s6 }
0x1949   :  { %v1028_v46 = vpop.permute.xlu1 %1027 }
0x194a   :  { %1675 = vmatmul.mubr.msk.bf16.vlgmr.msra.gmra.mrb[24].mxu0 %vm276_vm1, %v1028_v46 }
0x194b   :  { %1192 = vmatpush1.bf16.msra.mxu0 %v2377_v17  ;;  %1223 = vmatprep.mubr.bf16.mxu0 %v2086_v0 }
0x194c   :  { %1193 = vmatprep.subr.bf16.mxu0 %v2380_v19 }
0x194f   :  { %1194 = vmatpush1.bf16.msra.mxu0 %v2388_v20 }
0x1950   :  { %1345 = vmatprep.subr.bf16.mxu0 %v2375_v16 }
0x1a1d   :  { %v1066_v50 = vpop.f32.mrb[24].mxu0 }
0x1a1e   :  { %v1074_v51 = vadd.f32 %v1066_v50, %v480_v47  ;;  %v1068_v52 = vpop.f32.mrb[25].mxu0 }
0x1a1f   :  { %v1081_v53 = vadd.f32 %v2427_v48, %v1068_v52  ;;  %v1070_v54 = vpop.f32.mrb[26].mxu0 }
0x1a20   :  { %1833 = vtanh.f32 %v1074_v51  ;;  %v1071_v55 = vpop.f32.mrb[27].mxu0  ;;  %v1677_v62 = vmul.f32 -1.442695, %v1074_v51 }
0x1a21   :  { %1082 = vst.msk [vmem:[#allocation15] sm:$0xff] %vm276_vm1, %v1081_v53 }
0x1a22   :  { %1835 = vpow2.f32 %v1677_v62 }
0x1a2a   :  { %v1834_v60 = vpop.eup %1833 }
0x1a2b   :  { %1092 = vrot.lane.b32.xlu0 %v1834_v60, %s2077_s13 }
0x1a2c   :  { %v1836_v57 = vpop.eup %1835 }
0x1a2d   :  { %v1086_v63 = vadd.f32 1.0, %v1836_v57 }
0x1a2f   :  { %1837 = vrcp.f32 %v1086_v63 }
0x1a39   :  { %v1838_v1 = vpop.eup %1837 }
0x1a3a   :  { %v1090_v10 = vmul.f32 %v1838_v1, %v1018_v42 }
0x1a9d   :  { %v1093_v4 = vpop.permute.xlu0 %1092 }
0x1a9e   :  { %v1095_v5 = vmul.f32 %v1838_v1, %v1093_v4 }
0x1aa0   :  { %1097 = vrot.lane.b32.xlu1 %v1095_v5, %s2087_s6 }
0x1b12   :  { %v1098_v11 = vpop.permute.xlu1 %1097 }
0x1b13   :  { %v1100_v13 = vadd.f32 %v1098_v11, %v1090_v10  ;;  %v711_v10 = vadd.f32 %v2409_v6, %v2352_v9 }
0x1b15   :  { %1839 = vtanh.f32 %v1100_v13 }
0x1b1f   :  { %v1840_v14 = vpop.eup %1839 }
0x1b20   :  { %1103 = vrot.lane.b32.xlu0 %v1840_v14, %s2077_s13 }
0x1b92   :  { %v1104_v8 = vpop.permute.xlu0 %1103 }
0x1b93   :  { %v1106_v58 = vmul.f32 %v1838_v1, %v1104_v8 }
0x1b95   :  { %v1107_v15 = vpack.c.bf16 %v1106_v58, %v1106_v58 }
0x1b97   :  { %1109 = vrot.lane.b32.xlu1 %v1107_v15, %s2087_s6 }
0x1c09   :  { %v1110_v3 = vpop.permute.xlu1 %1109 }
0x1c0a   :  { %1678 = vmatmul.mubr.msk.bf16.vlgmr.msra.gmra.mrb[24].mxu1 %vm276_vm1, %v1110_v3 }
0x1c0b   :  { %1269 = vmatpush1.bf16.msra.mxu1 %v2377_v17  ;;  %1300 = vmatprep.mubr.bf16.mxu1 %v2086_v0 }
0x1c0c   :  { %1270 = vmatprep.subr.bf16.mxu1 %v2380_v19 }
0x1c0f   :  { %1271 = vmatpush1.bf16.msra.mxu1 %v2388_v20 }
0x1c10   :  { %1422 = vmatprep.subr.bf16.mxu1 %v2375_v16 }
0x1cdd   :  { %v1148_v21 = vpop.f32.mrb[24].mxu1 }
0x1cde   :  { %v1156_v22 = vadd.f32 %v1148_v21, %v557_v2  ;;  %v1150_v23 = vpop.f32.mrb[25].mxu1 }
0x1cdf   :  { %v1157_v7 = vadd.f32 %v2427_v48, %v1150_v23  ;;  %v1152_v59 = vpop.f32.mrb[26].mxu1 }
0x1ce0   :  { %1841 = vtanh.f32 %v1156_v22  ;;  %v1153_v25 = vpop.f32.mrb[27].mxu1  ;;  %v1679_v27 = vmul.f32 -1.442695, %v1156_v22 }
0x1ce1   :  { %1159 = vst.msk [vmem:[#allocation15 + $0x8] sm:$0xff] %vm276_vm1, %v1157_v7 }
0x1ce2   :  { %1843 = vpow2.f32 %v1679_v27 }
0x1cea   :  { %v1842_v26 = vpop.eup %1841 }
0x1ceb   :  { %1169 = vrot.lane.b32.xlu0 %v1842_v26, %s2077_s13 }
0x1cec   :  { %v1844_v29 = vpop.eup %1843 }
0x1ced   :  { %v1163_v30 = vadd.f32 1.0, %v1844_v29 }
0x1cef   :  { %1845 = vrcp.f32 %v1163_v30 }
0x1cf9   :  { %v1846_v31 = vpop.eup %1845 }
0x1cfa   :  { %v1167_v33 = vmul.f32 %v1846_v31, %v1100_v13 }
0x1d5d   :  { %v1170_v28 = vpop.permute.xlu0 %1169 }
0x1d5e   :  { %v1172_v32 = vmul.f32 %v1846_v31, %v1170_v28 }
0x1d60   :  { %1174 = vrot.lane.b32.xlu1 %v1172_v32, %s2087_s6  ;;  %v788_v32 = vadd.f32 %v2409_v6, %v2361_v36 }
0x1dd2   :  { %v1175_v34 = vpop.permute.xlu1 %1174 }
0x1dd3   :  { %v1177_v35 = vadd.f32 %v1175_v34, %v1167_v33 }
0x1dd5   :  { %1847 = vtanh.f32 %v1177_v35 }
0x1ddf   :  { %v1848_v38 = vpop.eup %1847 }
0x1de0   :  { %1180 = vrot.lane.b32.xlu0 %v1848_v38, %s2077_s13 }
0x1e52   :  { %v1181_v37 = vpop.permute.xlu0 %1180 }
0x1e53   :  { %v1183_v12 = vmul.f32 %v1846_v31, %v1181_v37 }
0x1e55   :  { %v1184_v39 = vpack.c.bf16 %v1183_v12, %v1183_v12 }
0x1e57   :  { %1186 = vrot.lane.b32.xlu1 %v1184_v39, %s2087_s6 }
0x1ec9   :  { %v1187_v40 = vpop.permute.xlu1 %1186 }
0x1eca   :  { %1680 = vmatmul.mubr.msk.bf16.vlgmr.msra.gmra.mrb[28].mxu0 %vm276_vm1, %v1187_v40 }
0x1ecb   :  { %1346 = vmatpush1.bf16.msra.mxu0 %v2377_v17  ;;  %1377 = vmatprep.mubr.bf16.mxu0 %v2086_v0 }
0x1ecc   :  { %1347 = vmatprep.subr.bf16.mxu0 %v2380_v19 }
0x1ecf   :  { %1348 = vmatpush1.bf16.msra.mxu0 %v2388_v20 }
0x1ed0   :  { %1499 = vmatprep.subr.bf16.mxu0 %v2375_v16 }
0x1f9d   :  { %v1225_v42 = vpop.f32.mrb[28].mxu0 }
0x1f9e   :  { %v1233_v43 = vadd.f32 %v1225_v42, %v634_v41  ;;  %v1227_v44 = vpop.f32.mrb[29].mxu0 }
0x1f9f   :  { %v1234_v45 = vadd.f32 %v2427_v48, %v1227_v44  ;;  %v1229_v56 = vpop.f32.mrb[30].mxu0 }
0x1fa0   :  { %1849 = vtanh.f32 %v1233_v43  ;;  %v1230_v46 = vpop.f32.mrb[31].mxu0  ;;  %v1681_v50 = vmul.f32 -1.442695, %v1233_v43 }
0x1fa1   :  { %1236 = vst.msk [vmem:[#allocation15 + $0x10] sm:$0xff] %vm276_vm1, %v1234_v45 }
0x1fa2   :  { %1851 = vpow2.f32 %v1681_v50 }
0x1faa   :  { %v1850_v47 = vpop.eup %1849 }
0x1fab   :  { %1246 = vrot.lane.b32.xlu0 %v1850_v47, %s2077_s13 }
0x1fac   :  { %v1852_v51 = vpop.eup %1851 }
0x1fad   :  { %v1240_v52 = vadd.f32 1.0, %v1852_v51  ;;  %v865_v51 = vadd.f32 %v2409_v6, %v2371_v61 }
0x1faf   :  { %1853 = vrcp.f32 %v1240_v52 }
0x1fb9   :  { %v1854_v53 = vpop.eup %1853 }
0x1fba   :  { %v1244_v55 = vmul.f32 %v1854_v53, %v1177_v35 }
0x201d   :  { %v1247_v49 = vpop.permute.xlu0 %1246 }
0x201e   :  { %v1249_v54 = vmul.f32 %v1854_v53, %v1247_v49 }
0x2020   :  { %1251 = vrot.lane.b32.xlu1 %v1249_v54, %s2087_s6 }
0x2092   :  { %v1252_v60 = vpop.permute.xlu1 %1251 }
0x2093   :  { %v1254_v62 = vadd.f32 %v1252_v60, %v1244_v55 }
0x2095   :  { %1855 = vtanh.f32 %v1254_v62 }
0x209f   :  { %v1856_v57 = vpop.eup %1855 }
0x20a0   :  { %1257 = vrot.lane.b32.xlu0 %v1856_v57, %s2077_s13 }
0x2112   :  { %v1258_v63 = vpop.permute.xlu0 %1257 }
0x2113   :  { %v1260_v1 = vmul.f32 %v1854_v53, %v1258_v63 }
0x2115   :  { %v1261_v4 = vpack.c.bf16 %v1260_v1, %v1260_v1 }
0x2117   :  { %1263 = vrot.lane.b32.xlu1 %v1261_v4, %s2087_s6 }
0x2189   :  { %v1264_v5 = vpop.permute.xlu1 %1263 }
0x218a   :  { %1682 = vmatmul.mubr.msk.bf16.vlgmr.msra.gmra.mrb[28].mxu1 %vm276_vm1, %v1264_v5 }
0x218b   :  { %1423 = vmatpush1.bf16.msra.mxu1 %v2377_v17  ;;  %1454 = vmatprep.mubr.bf16.mxu1 %v2086_v0 }
0x218c   :  { %1424 = vmatprep.subr.bf16.mxu1 %v2380_v19 }
0x218f   :  { %1425 = vmatpush1.bf16.msra.mxu1 %v2388_v20 }
0x2190   :  { %1720 = vmatprep.subr.bf16.mxu1 %v2088_v18 }
0x225d   :  { %v1302_v11 = vpop.f32.mrb[28].mxu1 }
0x225e   :  { %v1310_v13 = vadd.f32 %v1302_v11, %v711_v10  ;;  %v1304_v14 = vpop.f32.mrb[29].mxu1 }
0x225f   :  { %v1311_v8 = vadd.f32 %v2427_v48, %v1304_v14  ;;  %v1306_v58 = vpop.f32.mrb[30].mxu1 }
0x2260   :  { %1857 = vtanh.f32 %v1310_v13  ;;  %v1307_v15 = vpop.f32.mrb[31].mxu1  ;;  %v1683_v2 = vmul.f32 -1.442695, %v1310_v13  ;;  %v933_v58 = vadd.f32 %v2409_v6, %v2413_v24 }
0x2261   :  { %1313 = vst.msk [vmem:[#allocation15 + $0x18] sm:$0xff] %vm276_vm1, %v1311_v8 }
0x2262   :  { %1859 = vpow2.f32 %v1683_v2 }
0x226a   :  { %v1858_v3 = vpop.eup %1857 }
0x226b   :  { %1323 = vrot.lane.b32.xlu0 %v1858_v3, %s2077_s13 }
0x226c   :  { %v1860_v21 = vpop.eup %1859 }
0x226d   :  { %v1317_v22 = vadd.f32 1.0, %v1860_v21 }
0x226f   :  { %1861 = vrcp.f32 %v1317_v22 }
0x2279   :  { %v1862_v23 = vpop.eup %1861 }
0x227a   :  { %v1321_v59 = vmul.f32 %v1862_v23, %v1254_v62 }
0x22dd   :  { %v1324_v9 = vpop.permute.xlu0 %1323 }
0x22de   :  { %v1326_v7 = vmul.f32 %v1862_v23, %v1324_v9 }
0x22e0   :  { %1328 = vrot.lane.b32.xlu1 %v1326_v7, %s2087_s6 }
0x2352   :  { %v1329_v25 = vpop.permute.xlu1 %1328 }
0x2353   :  { %v1331_v26 = vadd.f32 %v1329_v25, %v1321_v59 }
0x2355   :  { %1863 = vtanh.f32 %v1331_v26 }
0x235f   :  { %v1864_v27 = vpop.eup %1863 }
0x2360   :  { %1334 = vrot.lane.b32.xlu0 %v1864_v27, %s2077_s13 }
0x23d2   :  { %v1335_v29 = vpop.permute.xlu0 %1334 }
0x23d3   :  { %v1337_v30 = vmul.f32 %v1862_v23, %v1335_v29 }
0x23d5   :  { %v1338_v31 = vpack.c.bf16 %v1337_v30, %v1337_v30 }
0x23d7   :  { %1340 = vrot.lane.b32.xlu1 %v1338_v31, %s2087_s6 }
0x2449   :  { %v1341_v28 = vpop.permute.xlu1 %1340 }
0x244a   :  { %1684 = vmatmul.mubr.msk.bf16.vlgmr.msra.gmra.mrb[32].mxu0 %vm276_vm1, %v1341_v28 }
0x244b   :  { %1500 = vmatpush1.bf16.msra.mxu0 %v2377_v17  ;;  %1531 = vmatprep.mubr.bf16.mxu0 %v2086_v0 }
0x244c   :  { %1501 = vmatprep.subr.bf16.mxu0 %v2380_v19 }
0x244f   :  { %1502 = vmatpush1.bf16.msra.mxu0 %v2388_v20 }
0x251d   :  { %v1379_v33 = vpop.f32.mrb[32].mxu0 }
0x251e   :  { %v1387_v34 = vadd.f32 %v1379_v33, %v788_v32  ;;  %v1381_v35 = vpop.f32.mrb[33].mxu0 }
0x251f   :  { %v1388_v38 = vadd.f32 %v2427_v48, %v1381_v35  ;;  %v1383_v37 = vpop.f32.mrb[34].mxu0 }
0x2520   :  { %1865 = vtanh.f32 %v1387_v34  ;;  %v1384_v12 = vpop.f32.mrb[35].mxu0  ;;  %v1685_v0 = vmul.f32 -1.442695, %v1387_v34 }
0x2521   :  { %1390 = vst.msk [vmem:[#allocation15 + $0x20] sm:$0xff] %vm276_vm1, %v1388_v38 }
0x2522   :  { %1867 = vpow2.f32 %v1685_v0 }
0x252a   :  { %v1866_v17 = vpop.eup %1865 }
0x252b   :  { %1400 = vrot.lane.b32.xlu0 %v1866_v17, %s2077_s13 }
0x252c   :  { %v1868_v39 = vpop.eup %1867 }
0x252d   :  { %v1394_v20 = vadd.f32 1.0, %v1868_v39 }
0x252f   :  { %1869 = vrcp.f32 %v1394_v20 }
0x2539   :  { %v1870_v40 = vpop.eup %1869 }
0x253a   :  { %v1398_v42 = vmul.f32 %v1870_v40, %v1331_v26 }
0x259d   :  { %v1401_v36 = vpop.permute.xlu0 %1400 }
0x259e   :  { %v1403_v41 = vmul.f32 %v1870_v40, %v1401_v36 }
0x25a0   :  { %1405 = vrot.lane.b32.xlu1 %v1403_v41, %s2087_s6 }
0x2612   :  { %v1406_v43 = vpop.permute.xlu1 %1405 }
0x2613   :  { %v1408_v44 = vadd.f32 %v1406_v43, %v1398_v42 }
0x2615   :  { %1871 = vtanh.f32 %v1408_v44 }
0x261f   :  { %v1872_v45 = vpop.eup %1871 }
0x2620   :  { %1411 = vrot.lane.b32.xlu0 %v1872_v45, %s2077_s13 }
0x2692   :  { %v1412_v56 = vpop.permute.xlu0 %1411 }
0x2693   :  { %v1414_v46 = vmul.f32 %v1870_v40, %v1412_v56 }
0x2695   :  { %v1415_v47 = vpack.c.bf16 %v1414_v46, %v1414_v46 }
0x2697   :  { %1417 = vrot.lane.b32.xlu1 %v1415_v47, %s2087_s6 }
0x2709   :  { %v1418_v50 = vpop.permute.xlu1 %1417 }
0x270a   :  { %1686 = vmatmul.mubr.msk.bf16.vlgmr.msra.gmra.mrb[32].mxu1 %vm276_vm1, %v1418_v50 }
0x270b   :  { %1721 = vmatpush3.bf16.msra.mxu1 %v2375_v16  ;;  %1724 = vmatprep.mubr.msk.bf16.mxu1 %vm2089_vm2, %v2088_v18 }
0x270c   :  { %1722 = vmatprep.subr.bf16.mxu1 %v2088_v18 }
0x270f   :  { %1723 = vmatpush3.bf16.msra.mxu1 %v2380_v19 }
0x27dd   :  { %v1456_v52 = vpop.f32.mrb[32].mxu1 }
0x27de   :  { %v1464_v53 = vadd.f32 %v1456_v52, %v865_v51  ;;  %v1458_v49 = vpop.f32.mrb[33].mxu1 }
0x27df   :  { %v1465_v54 = vadd.f32 %v2427_v48, %v1458_v49  ;;  %v1460_v55 = vpop.f32.mrb[34].mxu1 }
0x27e0   :  { %1873 = vtanh.f32 %v1464_v53  ;;  %v1461_v60 = vpop.f32.mrb[35].mxu1  ;;  %v1687_v62 = vmul.f32 -1.442695, %v1464_v53 }
0x27e1   :  { %1467 = vst.msk [vmem:[#allocation15 + $0x28] sm:$0xff] %vm276_vm1, %v1465_v54 }
0x27e2   :  { %1875 = vpow2.f32 %v1687_v62 }
0x27ea   :  { %v1874_v16 = vpop.eup %1873 }
0x27eb   :  { %1477 = vrot.lane.b32.xlu0 %v1874_v16, %s2077_s13 }
0x27ec   :  { %v1876_v18 = vpop.eup %1875 }
0x27ed   :  { %v1471_v19 = vadd.f32 1.0, %v1876_v18 }
0x27ef   :  { %1877 = vrcp.f32 %v1471_v19 }
0x27f9   :  { %v1878_v57 = vpop.eup %1877 }
0x27fa   :  { %v1475_v1 = vmul.f32 %v1878_v57, %v1408_v44 }
0x285d   :  { %v1478_v61 = vpop.permute.xlu0 %1477 }
0x285e   :  { %v1480_v63 = vmul.f32 %v1878_v57, %v1478_v61 }
0x2860   :  { %1482 = vrot.lane.b32.xlu1 %v1480_v63, %s2087_s6 }
0x28d2   :  { %v1483_v4 = vpop.permute.xlu1 %1482 }
0x28d3   :  { %v1485_v5 = vadd.f32 %v1483_v4, %v1475_v1 }
0x28d5   :  { %1879 = vtanh.f32 %v1485_v5 }
0x28df   :  { %v1880_v10 = vpop.eup %1879 }
0x28e0   :  { %1488 = vrot.lane.b32.xlu0 %v1880_v10, %s2077_s13 }
0x2952   :  { %v1489_v11 = vpop.permute.xlu0 %1488 }
0x2953   :  { %v1491_v13 = vmul.f32 %v1878_v57, %v1489_v11 }
0x2955   :  { %v1492_v14 = vpack.c.bf16 %v1491_v13, %v1491_v13 }
0x2957   :  { %1494 = vrot.lane.b32.xlu1 %v1492_v14, %s2087_s6 }
0x29c9   :  { %v1495_v8 = vpop.permute.xlu1 %1494 }
0x29ca   :  { %1688 = vmatmul.mubr.msk.bf16.vlgmr.msra.gmra.mrb[36].mxu0 %vm276_vm1, %v1495_v8 }
0x2a9d   :  { %v1533_v15 = vpop.f32.mrb[36].mxu0 }
0x2a9e   :  { %v1541_v3 = vadd.f32 %v1533_v15, %v933_v58  ;;  %v1535_v2 = vpop.f32.mrb[37].mxu0 }
0x2a9f   :  { %v1542_v21 = vadd.f32 %v2427_v48, %v1535_v2  ;;  %v1537_v22 = vpop.f32.mrb[38].mxu0 }
0x2aa0   :  { %1881 = vtanh.f32 %v1541_v3  ;;  %v1538_v23 = vpop.f32.mrb[39].mxu0  ;;  %v1689_v7 = vmul.f32 -1.442695, %v1541_v3 }
0x2aa1   :  { %1544 = vst.msk [vmem:[#allocation15 + $0x30] sm:$0xff] %vm276_vm1, %v1542_v21 }
0x2aa2   :  { %1883 = vpow2.f32 %v1689_v7 }
0x2aaa   :  { %v1882_v9 = vpop.eup %1881 }
0x2aab   :  { %1554 = vrot.lane.b32.xlu0 %v1882_v9, %s2077_s13 }
0x2aac   :  { %v1884_v59 = vpop.eup %1883 }
0x2aad   :  { %v1548_v25 = vadd.f32 1.0, %v1884_v59 }
0x2aaf   :  { %1885 = vrcp.f32 %v1548_v25 }
0x2ab9   :  { %v1886_v26 = vpop.eup %1885 }
0x2aba   :  { %v1552_v27 = vmul.f32 %v1886_v26, %v1485_v5 }
0x2b1d   :  { %v1555_v6 = vpop.permute.xlu0 %1554 }
0x2b1e   :  { %v1557_v24 = vmul.f32 %v1886_v26, %v1555_v6 }
0x2b20   :  { %1559 = vrot.lane.b32.xlu1 %v1557_v24, %s2087_s6 }
0x2b92   :  { %v1560_v29 = vpop.permute.xlu1 %1559 }
0x2b93   :  { %v1562_v30 = vadd.f32 %v1560_v29, %v1552_v27 }
0x2b95   :  { %1887 = vtanh.f32 %v1562_v30 }
0x2b9f   :  { %v1888_v31 = vpop.eup %1887 }
0x2ba0   :  { %1565 = vrot.lane.b32.xlu0 %v1888_v31, %s2077_s13  ;;  %s2043_s13 = scalar_lea.vmem %s1624_s8, 1024 }
0x2ba1   :  { %p2044_p0 = scmp.ne.s32.totalorder %s1624_s8, %s2043_s13  ;;  %p2049_p2 = scmp.lt.s32.totalorder %s2043_s13, %s2043_s13 }
0x2ba3   :  { %p2050_p3 = por %p2049_p2, %p2048_p1 }
0x2ba5   :  { %p2051_p4 = pnand %p2050_p3, %p2044_p0 }
0x2c12   :  { %v1566_v28 = vpop.permute.xlu0 %1565 }
0x2c13   :  { %v1568_v32 = vmul.f32 %v1886_v26, %v1566_v28 }
0x2c15   :  { %v1569_v33 = vpack.c.bf16 %v1568_v32, %v1568_v32 }
0x2c17   :  { %1571 = vrot.lane.b32.xlu1 %v1569_v33, %s2087_s6 }
0x2c89   :  { %v1572_v34 = vpop.permute.xlu1 %1571 }
0x2c8a   :  { %1725 = vmatmul.mubr.msk.bf16.vlgmr.msra.gmra.mrb[36].mxu1 %vm276_vm1, %v1572_v34 }
0x2d5d   :  { %v1610_v35 = vpop.f32.mrb[36].mxu1 }
0x2d5e   :  { %v1611_v38 = vadd.f32 %v2427_v48, %v1610_v35  ;;  %v1726_v37 = vpop.f32.mrb[37].mxu1 }
0x2d5f   :  { %v1613_v12 = vpop.f32.mrb[38].mxu1 }
0x2d60   :  { %1617 = vst.msk [vmem:[#allocation15 + $0x38] sm:$0xff] %vm276_vm1, %v1611_v38  ;;  %v1727_v17 = vpop.f32.mrb[39].mxu1 }
0x2d61   :  { %2054 = shalt.err (!%p2051_p4)
}
0x2d62   :  { %s2055_s23 = scalar_lea.hbm %s2538_s7, 1024 }
0x2d63   :  { %p2056_p5 = scmp.ne.s32.totalorder %s2538_s7, %s2055_s23  ;;  %p2059_p6 = scmp.lt.u32.totalorder %s2055_s23, %s2538_s7 }
0x2d65   :  { %p2061_p7 = pnand %p2059_p6, %p2056_p5 }
0x2d67   :  { %2064 = shalt.err (!%p2061_p7)
}
0x2d68   :  { %1629 = dma.vmem_to_hbm [thread:$0]  %s1624_s8, 1024, %s2538_s7, [#allocation5], %s2081_s27, %s2081_s27, %s2082_s18  }
0x2d69   :  { %2073 = dma.done.wait [#allocation5], 1024  }
0x2d6a   :  { %2074 = vsyncadd [#allocation5], 4294966272 }
0x2d6b   :  { %1633 = vsyncpa [#allocation4], 1 }
0x2d6c   :  { %1634 = vsyncpa [#allocation7], 1 }
0x2d6d   :  { %1635 = vsyncpa [#allocation10], 1 }
0x2d6e   :  { %1636 = vsyncpa [#allocation13], 1 }
0x2d6f   :  { %1637 = vsyncpa [#allocation5], 1 }

</bundles_post_ra>
